<compile_context>
chip_gen: v5e
topology: v5e:2x2
jax: 0.10.0
libtpu: 0.0.40
codegen_flags: <defaults>
</compile_context>

<pallas_src>
import math
import functools

import numpy as np
import jax
import jax.numpy as jnp
from jax import lax
from jax.experimental import pallas as pl
from jax.experimental.pallas import tpu as pltpu


_NEG_BIG = -1e30  # finite "-inf": exp(-1e30 - m) -> 0, never NaN


# ----------------------------- in-kernel math helpers -----------------------------

def _erf(x):
    # Abramowitz & Stegun 7.1.26, |err| < 1.5e-7 — avoids relying on an erf lowering in Mosaic.
    a1, a2, a3, a4, a5 = 0.254829592, -0.284496736, 1.421413741, -1.453152027, 1.061405429
    p = 0.3275911
    s = jnp.where(x >= 0.0, 1.0, -1.0)
    ax = jnp.abs(x)
    t = 1.0 / (1.0 + p * ax)
    poly = ((((a5 * t + a4) * t + a3) * t + a2) * t + a1) * t
    return s * (1.0 - poly * jnp.exp(-ax * ax))


def _gelu_exact(x):
    # matches torch.nn.functional.gelu(x, approximate='none')
    return 0.5 * x * (1.0 + _erf(x * (1.0 / math.sqrt(2.0))))


# ----------------------------------- fused kernel ----------------------------------

def _fused_transformer_kernel(x_ref, pe_ref, mask_ref, mv_ref, seg_ref,
                              wqkv_ref, bqkv_ref, wo_ref, bo_ref,
                              ln1w_ref, ln1b_ref,
                              w1_ref, b1_ref, w2_ref, b2_ref,
                              ln2w_ref, ln2b_ref,
                              o_ref, *, nlayers, nhead, d_real):
    BT, Dp = x_ref.shape                     # rows = B*T, cols = padded d_model (128)
    hd = d_real // nhead
    scale = 1.0 / math.sqrt(hd)
    inv_d = 1.0 / d_real

    # column mask: 1 on the real d_model columns, 0 on the zero pad (for the LN variance)
    col = lax.broadcasted_iota(jnp.int32, (1, Dp), 1)
    col_mask = jnp.where(col < d_real, 1.0, 0.0).astype(jnp.float32)

    def layernorm(x, w, b, eps=1e-5):
        # pad columns of x are exactly 0, so sums over all Dp columns == sums over real D
        mu = jnp.sum(x, axis=-1, keepdims=True) * inv_d
        xc = x - mu
        xm = xc * col_mask                   # drop pad columns from the variance
        var = jnp.sum(xm * xm, axis=-1, keepdims=True) * inv_d
        # w,b are zero-padded -> padded output columns stay exactly 0
        return xc * lax.rsqrt(var + eps) * w + b

    mask = mask_ref[...]                     # (BT, nhead*BT)  additive causal/block-batch mask
    mv = mv_ref[...]                         # (nhead*BT, Dp)  0/1 head-column selector
    seg = seg_ref[...]                       # (nhead*BT, nhead*BT) block-diag ones (f32)

    # PositionalEncoding (+ eval-mode dropout == identity); pad columns stay 0
    x = x_ref[...] + pe_ref[...]             # (BT, Dp) float32

    for l in range(nlayers):                 # static unroll; weights stay resident in VMEM
        # ---- multi-head self-attention (torch.nn.MultiheadAttention semantics) ----
        xb = x.astype(jnp.bfloat16)
        qkv = jnp.dot(xb, wqkv_ref[l], preferred_element_type=jnp.float32) + bqkv_ref[l]
        q = qkv[:, 0 * Dp:1 * Dp] * scale    # 128-lane aligned slices
        k = qkv[:, 1 * Dp:2 * Dp]
        v = qkv[:, 2 * Dp:3 * Dp]

        # head-expanded K / V: row h*BT+j holds k[j] / v[j] restricted to head h's columns.
        # Pure sublane-tile + VPU mask multiply — no transposes, no 8-lane slices.
        k_exp = (jnp.tile(k, (nhead, 1)) * mv).astype(jnp.bfloat16)   # (nhead*BT, Dp)
        v_bd = (jnp.tile(v, (nhead, 1)) * mv).astype(jnp.bfloat16)    # (nhead*BT, Dp)

        # all heads' scores in ONE MXU launch, lane-dense (BT, nhead*BT)
        s = lax.dot_general(q.astype(jnp.bfloat16), k_exp,
                            (((1,), (1,)), ((), ())),
                            preferred_element_type=jnp.float32) + mask
        # global row max (softmax is shift-invariant; every head segment contains the
        # unmasked diagonal entry, so no segment can underflow to a zero denominator)
        m = jnp.max(s, axis=-1, keepdims=True)
        e = jnp.exp(s - m)
        # per-(row, head) denominator broadcast along each BT-lane segment via f32 matmul
        den = jnp.dot(e, seg, preferred_element_type=jnp.float32)
        p = e * pl.reciprocal(den, approx=True)
        # context: directly the concatenated heads in padded layout (pad columns stay 0)
        ctx = jnp.dot(p.astype(jnp.bfloat16), v_bd, preferred_element_type=jnp.float32)

        attn = jnp.dot(ctx.astype(jnp.bfloat16), wo_ref[l],
                       preferred_element_type=jnp.float32) + bo_ref[l]

        # dropout == identity (eval); post-LN residual (norm_first=False)
        x1 = layernorm(x + attn, ln1w_ref[l], ln1b_ref[l])

        # ---- feed-forward: linear1 -> gelu -> linear2, post-LN residual ----
        h1 = jnp.dot(x1.astype(jnp.bfloat16), w1_ref[l],
                     preferred_element_type=jnp.float32) + b1_ref[l]
        h1 = _gelu_exact(h1)
        ff = jnp.dot(h1.astype(jnp.bfloat16), w2_ref[l],
                     preferred_element_type=jnp.float32) + b2_ref[l]
        x = layernorm(x1 + ff, ln2w_ref[l], ln2b_ref[l])

    o_ref[...] = x.astype(o_ref.dtype)       # (BT, 128) lane-dense store


# ----------------------------- one-time parameter prep ------------------------------

def make_pe(T, d_model):
    # sinusoidal positional encoding, identical to the torch PositionalEncoding buffer
    position = jnp.arange(T, dtype=jnp.float32)[:, None]
    div_term = jnp.exp(jnp.arange(0, d_model, 2, dtype=jnp.float32)
                       * (-math.log(10000.0) / d_model))
    ang = position * div_term                                 # (T, d_model/2)
    pe = jnp.stack([jnp.sin(ang), jnp.cos(ang)], axis=-1).reshape(T, d_model)
    return pe.astype(jnp.float32)


def _pad_cols(a, width):
    return jnp.pad(a, [(0, 0)] * (a.ndim - 1) + [(0, width - a.shape[-1])])


def prepare_params(params, *, nhead, B, T):
    """One-time prep (hoisted out of the forward path): transpose, zero-pad d_model to 128,
    stack per-layer weights along a leading layer axis, cast MXU operands to bf16, and build
    the constant PE rows / attention masks / head selectors."""
    D = params[0]["wo"].shape[0]
    F = params[0]["w1"].shape[0]
    Dp = max(128, D)                              # lane-dense padded d_model
    Fp = max(128, F)
    hd = D // nhead
    BT = B * T

    def stack(f):
        return jnp.stack([f(p) for p in params], axis=0)

    def pad_mat(w_t, rows, cols):                 # place w_t in the top-left corner
        return jnp.zeros((rows, cols), jnp.float32).at[:w_t.shape[0], :w_t.shape[1]].set(w_t)

    def qkv_w(p):
        wt = p["wqkv"].T                          # (D, 3D), column blocks = [q|k|v]
        out = jnp.zeros((Dp, 3 * Dp), jnp.float32)
        for i in range(3):
            out = out.at[:D, i * Dp:i * Dp + D].set(wt[:, i * D:(i + 1) * D])
        return out

    def qkv_b(p):
        b = p["bqkv"].reshape(3, D)
        return jnp.zeros((3, Dp), jnp.float32).at[:, :D].set(b).reshape(1, 3 * Dp)

    prepped = dict(
        wqkv=stack(qkv_w).astype(jnp.bfloat16),                          # (L, Dp, 3Dp)
        bqkv=stack(qkv_b),                                               # (L, 1, 3Dp)
        wo=stack(lambda p: pad_mat(p["wo"].T, Dp, Dp)).astype(jnp.bfloat16),
        bo=stack(lambda p: _pad_cols(p["bo"], Dp)),
        ln1w=stack(lambda p: _pad_cols(p["ln1w"], Dp)),                  # zero-padded on purpose
        ln1b=stack(lambda p: _pad_cols(p["ln1b"], Dp)),
        w1=stack(lambda p: pad_mat(p["w1"].T, Dp, Fp)).astype(jnp.bfloat16),
        b1=stack(lambda p: _pad_cols(p["b1"], Fp)),
        w2=stack(lambda p: pad_mat(p["w2"].T, Fp, Dp)).astype(jnp.bfloat16),
        b2=stack(lambda p: _pad_cols(p["b2"], Dp)),
        ln2w=stack(lambda p: _pad_cols(p["ln2w"], Dp)),
        ln2b=stack(lambda p: _pad_cols(p["ln2b"], Dp)),
    )

    # constant activation-side inputs (B-tiled PE, masks) — built once, not per call
    pe_rows = jnp.tile(_pad_cols(make_pe(T, D), Dp), (B, 1))             # (B*T, Dp)

    idx = np.arange(BT)
    bq, pq = idx // T, idx % T
    ok = (bq[:, None] == bq[None, :]) & (pq[None, :] <= pq[:, None])     # same batch AND causal
    mask_bt = np.where(ok, 0.0, _NEG_BIG).astype(np.float32)
    mask_t = jnp.asarray(np.tile(mask_bt, (1, nhead)))                   # (BT, nhead*BT)

    rows = np.arange(nhead * BT)
    h_of_row = rows // BT
    d = np.arange(Dp)
    mv = ((d[None, :] // hd) == h_of_row[:, None]) & (d[None, :] < D)    # head-column selector
    mv = jnp.asarray(mv.astype(np.float32))                              # (nhead*BT, Dp)

    seg = (rows[:, None] // BT) == (rows[None, :] // BT)                 # per-head segment ones
    seg = jnp.asarray(seg.astype(np.float32))                            # (nhead*BT, nhead*BT)

    consts = dict(pe_rows=pe_rows, mask_t=mask_t, mv=mv, seg=seg)
    return prepped, consts


# ----------------------------------- forward --------------------------------------

@jax.jit
def causal_transformer_forward(x_tbd, prepped, consts):
    """x_tbd: [T, B, d_model] (seq-first, like the torch module). Returns [T, B, d_model]."""
    T, B, D = x_tbd.shape
    BT = B * T
    pe_rows, mask_t = consts["pe_rows"], consts["mask_t"]
    mv, seg = consts["mv"], consts["seg"]
    Dp = pe_rows.shape[-1]
    nhead = mask_t.shape[1] // BT
    nlayers = prepped["wqkv"].shape[0]

    # [T,B,D] -> batch-major rows (B*T, Dp): batch folds into the matmul M dimension;
    # d_model zero-padded to 128 lanes (pad columns stay exactly 0 through the kernel).
    x_rows = jnp.transpose(x_tbd, (1, 0, 2)).reshape(BT, D)
    x_rows = jnp.pad(x_rows, ((0, 0), (0, Dp - D)))

    kern = functools.partial(_fused_transformer_kernel,
                             nlayers=nlayers, nhead=nhead, d_real=D)
    # Single program, no grid: activations + all layer weights (< 1 MiB) are DMA'd once and
    # stay VMEM-resident for the whole forward pass (right call for 1-TC v5e/v6e at this size).
    out = pl.pallas_call(
        kern,
        out_shape=jax.ShapeDtypeStruct((BT, Dp), jnp.float32),
        compiler_params=pltpu.CompilerParams(vmem_limit_bytes=32 * 1024 * 1024),
    )(x_rows, pe_rows, mask_t, mv, seg,
      prepped["wqkv"], prepped["bqkv"], prepped["wo"], prepped["bo"],
      prepped["ln1w"], prepped["ln1b"],
      prepped["w1"], prepped["b1"], prepped["w2"], prepped["b2"],
      prepped["ln2w"], prepped["ln2b"])

    return jnp.transpose(out[:, :D].reshape(B, T, D), (1, 0, 2))         # back to [T,B,D]


# -------------------------- deterministic parameter init ---------------------------

def init_params(key, d_model, nlayers, dim_ff):
    params = []
    for _ in range(nlayers):
        key, *ks = jax.random.split(key, 9)
        rand = lambda k, shape, s: (jax.random.normal(k, shape, jnp.float32) * s)
        params.append(dict(
            wqkv=rand(ks[0], (3 * d_model, d_model), 0.05),
            bqkv=rand(ks[1], (1, 3 * d_model), 0.02),
            wo=rand(ks[2], (d_model, d_model), 0.05),
            bo=rand(ks[3], (1, d_model), 0.02),
            ln1w=jnp.ones((1, d_model), jnp.float32),
            ln1b=jnp.zeros((1, d_model), jnp.float32),
            w1=rand(ks[4], (dim_ff, d_model), 0.05),
            b1=rand(ks[5], (1, dim_ff), 0.02),
            w2=rand(ks[6], (d_model, dim_ff), 0.05),
            b2=rand(ks[7], (1, d_model), 0.02),
            ln2w=jnp.ones((1, d_model), jnp.float32),
            ln2b=jnp.zeros((1, d_model), jnp.float32),
        ))
    return params


# ------------------------------ pure-JAX reference ---------------------------------

def make_causal_mask(T):
    r = jnp.arange(T)
    return jnp.where(r[None, :] > r[:, None], -jnp.inf, 0.0).astype(jnp.float32)


def _ref_ln(x, w, b, eps=1e-5):
    mu = jnp.mean(x, axis=-1, keepdims=True)
    var = jnp.mean((x - mu) ** 2, axis=-1, keepdims=True)
    return (x - mu) / jnp.sqrt(var + eps) * w + b


def reference_forward(x_tbd, params, nhead):
    T, B, D = x_tbd.shape
    hd = D // nhead
    x = x_tbd + make_pe(T, D)[:, None, :]
    mask = make_causal_mask(T)
    hp = dict(precision="highest")
    for p in params:
        qkv = jnp.einsum("tbd,ed->tbe", x, p["wqkv"], **hp) + p["bqkv"][0]
        q = (qkv[..., :D] / math.sqrt(hd)).reshape(T, B, nhead, hd)
        k = qkv[..., D:2 * D].reshape(T, B, nhead, hd)
        v = qkv[..., 2 * D:].reshape(T, B, nhead, hd)
        s = jnp.einsum("tbhd,sbhd->bhts", q, k, **hp) + mask
        a = jax.nn.softmax(s, axis=-1)
        ctx = jnp.einsum("bhts,sbhd->tbhd", a, v, **hp).reshape(T, B, D)
        attn = jnp.einsum("tbd,ed->tbe", ctx, p["wo"], **hp) + p["bo"][0]
        x1 = _ref_ln(x + attn, p["ln1w"][0], p["ln1b"][0])
        h = jnp.einsum("tbd,fd->tbf", x1, p["w1"], **hp) + p["b1"][0]
        h = jax.nn.gelu(h, approximate=False)
        ff = jnp.einsum("tbf,df->tbd", h, p["w2"], **hp) + p["b2"][0]
        x = _ref_ln(x1 + ff, p["ln2w"][0], p["ln2b"][0])
    return x


# ------------------------------------- main -----------------------------------------

if __name__ == "__main__":
    T, B = 8, 2
    d_model = 64
    nlayers = 2
    # note: the torch module hardcodes nhead=8 inside nn.TransformerEncoderLayer,
    # regardless of the constructor's `nhead` argument — we reproduce that.
    nhead_layer = 8
    dim_ff = int(d_model * 2.0)

    key = jax.random.PRNGKey(0)
    kx, kp = jax.random.split(key)
    x_tbd = jax.random.normal(kx, (T, B, d_model), dtype=jnp.float32)
    params = init_params(kp, d_model, nlayers, dim_ff)

    # one-time weight prep (hoisted out of the forward path)
    prepped, consts = prepare_params(params, nhead=nhead_layer, B=B, T=T)

    out = causal_transformer_forward(x_tbd, prepped, consts)
    out = jax.block_until_ready(out)

    assert out.shape == (T, B, d_model)
    assert bool(jnp.all(jnp.isfinite(out)))

    ref = reference_forward(x_tbd, params, nhead_layer)
    np.testing.assert_allclose(np.asarray(out), np.asarray(ref), atol=5e-2, rtol=5e-2)

    print("KERNEL_OK")
</pallas_src>

<mosaic_0001>
module attributes {stable_mosaic.version = 11 : i64} {
  func.func @_fused_transformer_kernel(%arg0: memref<16x128xf32, #tpu.memory_space<vmem>>, %arg1: memref<16x128xf32, #tpu.memory_space<vmem>>, %arg2: memref<16x128xf32, #tpu.memory_space<vmem>>, %arg3: memref<128x128xf32, #tpu.memory_space<vmem>>, %arg4: memref<128x128xf32, #tpu.memory_space<vmem>>, %arg5: memref<2x128x384xbf16, #tpu.memory_space<vmem>>, %arg6: memref<2x1x384xf32, #tpu.memory_space<vmem>>, %arg7: memref<2x128x128xbf16, #tpu.memory_space<vmem>>, %arg8: memref<2x1x128xf32, #tpu.memory_space<vmem>>, %arg9: memref<2x1x128xf32, #tpu.memory_space<vmem>>, %arg10: memref<2x1x128xf32, #tpu.memory_space<vmem>>, %arg11: memref<2x128x128xbf16, #tpu.memory_space<vmem>>, %arg12: memref<2x1x128xf32, #tpu.memory_space<vmem>>, %arg13: memref<2x128x128xbf16, #tpu.memory_space<vmem>>, %arg14: memref<2x1x128xf32, #tpu.memory_space<vmem>>, %arg15: memref<2x1x128xf32, #tpu.memory_space<vmem>>, %arg16: memref<2x1x128xf32, #tpu.memory_space<vmem>>, %arg17: memref<16x128xf32, #tpu.memory_space<vmem>>) attributes {dimension_semantics = [], scalar_prefetch = 0 : i64, scratch_operands = 0 : i64, tpu.core_type = #tpu.core_type<tc>} {
    %0 = tpu.iota {dimensions = array<i32: 1>} : vector<1x128xi32>
    %c64_i32 = arith.constant 64 : i32
    %1 = vector.broadcast %c64_i32 : i32 to vector<1x128xi32>
    %2 = arith.cmpi slt, %0, %1 : vector<1x128xi32>
    %cst = arith.constant 1.000000e+00 : f32
    %cst_0 = arith.constant 0.000000e+00 : f32
    %3 = vector.broadcast %cst : f32 to vector<1x128xf32>
    %4 = vector.broadcast %cst_0 : f32 to vector<1x128xf32>
    %5 = arith.select %2, %3, %4 : vector<1x128xi1>, vector<1x128xf32>
    %c0 = arith.constant 0 : index
    %c0_1 = arith.constant 0 : index
    %6 = vector.load %arg2[%c0, %c0_1] : memref<16x128xf32, #tpu.memory_space<vmem>>, vector<16x128xf32>
    %c0_2 = arith.constant 0 : index
    %c0_3 = arith.constant 0 : index
    %7 = vector.load %arg3[%c0_2, %c0_3] : memref<128x128xf32, #tpu.memory_space<vmem>>, vector<128x128xf32>
    %c0_4 = arith.constant 0 : index
    %c0_5 = arith.constant 0 : index
    %8 = vector.load %arg4[%c0_4, %c0_5] : memref<128x128xf32, #tpu.memory_space<vmem>>, vector<128x128xf32>
    %c0_6 = arith.constant 0 : index
    %c0_7 = arith.constant 0 : index
    %9 = vector.load %arg0[%c0_6, %c0_7] : memref<16x128xf32, #tpu.memory_space<vmem>>, vector<16x128xf32>
    %c0_8 = arith.constant 0 : index
    %c0_9 = arith.constant 0 : index
    %10 = vector.load %arg1[%c0_8, %c0_9] : memref<16x128xf32, #tpu.memory_space<vmem>>, vector<16x128xf32>
    %11 = arith.addf %9, %10 : vector<16x128xf32>
    %12 = arith.truncf %11 : vector<16x128xf32> to vector<16x128xbf16>
    %c0_10 = arith.constant 0 : index
    %c0_11 = arith.constant 0 : index
    %c0_12 = arith.constant 0 : index
    %13 = vector.load %arg5[%c0_10, %c0_11, %c0_12] : memref<2x128x384xbf16, #tpu.memory_space<vmem>>, vector<1x128x384xbf16>
    %14 = vector.shape_cast %13 : vector<1x128x384xbf16> to vector<128x384xbf16>
    %cst_13 = arith.constant dense<0.000000e+00> : vector<16x384xf32>
    %15 = tpu.matmul %12, %14, %cst_13 {dimension_numbers = #tpu.dot_dimension_numbers<[1], [0], [0], [1], [0, 0, 1, 1], [], []>} : vector<16x128xbf16>, vector<128x384xbf16>, vector<16x384xf32> -> vector<16x384xf32>
    %c0_14 = arith.constant 0 : index
    %c0_15 = arith.constant 0 : index
    %c0_16 = arith.constant 0 : index
    %16 = vector.load %arg6[%c0_14, %c0_15, %c0_16] : memref<2x1x384xf32, #tpu.memory_space<vmem>>, vector<1x1x384xf32>
    %17 = vector.shape_cast %16 : vector<1x1x384xf32> to vector<1x384xf32>
    %18 = vector.broadcast %17 : vector<1x384xf32> to vector<16x384xf32>
    %19 = arith.addf %15, %18 : vector<16x384xf32>
    %20 = vector.extract_strided_slice %19 {offsets = [0, 0], sizes = [16, 128], strides = [1, 1]} : vector<16x384xf32> to vector<16x128xf32>
    %cst_17 = arith.constant 0.353553385 : f32
    %21 = vector.broadcast %cst_17 : f32 to vector<16x128xf32>
    %22 = arith.mulf %20, %21 : vector<16x128xf32>
    %23 = vector.extract_strided_slice %19 {offsets = [0, 128], sizes = [16, 128], strides = [1, 1]} : vector<16x384xf32> to vector<16x128xf32>
    %24 = vector.extract_strided_slice %19 {offsets = [0, 256], sizes = [16, 128], strides = [1, 1]} : vector<16x384xf32> to vector<16x128xf32>
    %25 = tpu.concatenate %23, %23, %23, %23, %23, %23, %23, %23 in 0 : vector<16x128xf32>, vector<16x128xf32>, vector<16x128xf32>, vector<16x128xf32>, vector<16x128xf32>, vector<16x128xf32>, vector<16x128xf32>, vector<16x128xf32> -> vector<128x128xf32>
    %26 = arith.mulf %25, %7 : vector<128x128xf32>
    %27 = arith.truncf %26 : vector<128x128xf32> to vector<128x128xbf16>
    %28 = tpu.concatenate %24, %24, %24, %24, %24, %24, %24, %24 in 0 : vector<16x128xf32>, vector<16x128xf32>, vector<16x128xf32>, vector<16x128xf32>, vector<16x128xf32>, vector<16x128xf32>, vector<16x128xf32>, vector<16x128xf32> -> vector<128x128xf32>
    %29 = arith.mulf %28, %7 : vector<128x128xf32>
    %30 = arith.truncf %29 : vector<128x128xf32> to vector<128x128xbf16>
    %31 = arith.truncf %22 : vector<16x128xf32> to vector<16x128xbf16>
    %cst_18 = arith.constant dense<0.000000e+00> : vector<16x128xf32>
    %32 = tpu.matmul %31, %27, %cst_18 {dimension_numbers = #tpu.dot_dimension_numbers<[1], [1], [0], [0], [0, 0, 1, 0], [], []>} : vector<16x128xbf16>, vector<128x128xbf16>, vector<16x128xf32> -> vector<16x128xf32>
    %33 = arith.addf %32, %6 : vector<16x128xf32>
    %cst_19 = arith.constant dense<0xFF800000> : vector<16xf32>
    %34 = vector.multi_reduction <maximumf>, %33, %cst_19 [1] : vector<16x128xf32> to vector<16xf32>
    %35 = vector.shape_cast %34 : vector<16xf32> to vector<16x1xf32>
    %36 = vector.broadcast %35 : vector<16x1xf32> to vector<16x128xf32>
    %37 = arith.subf %33, %36 : vector<16x128xf32>
    %38 = math.exp %37 : vector<16x128xf32>
    %cst_20 = arith.constant dense<0.000000e+00> : vector<16x128xf32>
    %39 = tpu.matmul %38, %8, %cst_20 {dimension_numbers = #tpu.dot_dimension_numbers<[1], [0], [0], [1], [0, 0, 1, 1], [], []>} : vector<16x128xf32>, vector<128x128xf32>, vector<16x128xf32> -> vector<16x128xf32>
    %40 = tpu.reciprocal %39 {approx = true} : vector<16x128xf32> -> vector<16x128xf32>
    %41 = arith.mulf %38, %40 : vector<16x128xf32>
    %42 = arith.truncf %41 : vector<16x128xf32> to vector<16x128xbf16>
    %cst_21 = arith.constant dense<0.000000e+00> : vector<16x128xf32>
    %43 = tpu.matmul %42, %30, %cst_21 {dimension_numbers = #tpu.dot_dimension_numbers<[1], [0], [0], [1], [0, 0, 1, 1], [], []>} : vector<16x128xbf16>, vector<128x128xbf16>, vector<16x128xf32> -> vector<16x128xf32>
    %44 = arith.truncf %43 : vector<16x128xf32> to vector<16x128xbf16>
    %c0_22 = arith.constant 0 : index
    %c0_23 = arith.constant 0 : index
    %c0_24 = arith.constant 0 : index
    %45 = vector.load %arg7[%c0_22, %c0_23, %c0_24] : memref<2x128x128xbf16, #tpu.memory_space<vmem>>, vector<1x128x128xbf16>
    %46 = vector.shape_cast %45 : vector<1x128x128xbf16> to vector<128x128xbf16>
    %cst_25 = arith.constant dense<0.000000e+00> : vector<16x128xf32>
    %47 = tpu.matmul %44, %46, %cst_25 {dimension_numbers = #tpu.dot_dimension_numbers<[1], [0], [0], [1], [0, 0, 1, 1], [], []>} : vector<16x128xbf16>, vector<128x128xbf16>, vector<16x128xf32> -> vector<16x128xf32>
    %c0_26 = arith.constant 0 : index
    %c0_27 = arith.constant 0 : index
    %c0_28 = arith.constant 0 : index
    %48 = vector.load %arg8[%c0_26, %c0_27, %c0_28] : memref<2x1x128xf32, #tpu.memory_space<vmem>>, vector<1x1x128xf32>
    %49 = vector.shape_cast %48 : vector<1x1x128xf32> to vector<1x128xf32>
    %50 = vector.broadcast %49 : vector<1x128xf32> to vector<16x128xf32>
    %51 = arith.addf %47, %50 : vector<16x128xf32>
    %52 = arith.addf %11, %51 : vector<16x128xf32>
    %c0_29 = arith.constant 0 : index
    %c0_30 = arith.constant 0 : index
    %c0_31 = arith.constant 0 : index
    %53 = vector.load %arg9[%c0_29, %c0_30, %c0_31] : memref<2x1x128xf32, #tpu.memory_space<vmem>>, vector<1x1x128xf32>
    %54 = vector.shape_cast %53 : vector<1x1x128xf32> to vector<1x128xf32>
    %c0_32 = arith.constant 0 : index
    %c0_33 = arith.constant 0 : index
    %c0_34 = arith.constant 0 : index
    %55 = vector.load %arg10[%c0_32, %c0_33, %c0_34] : memref<2x1x128xf32, #tpu.memory_space<vmem>>, vector<1x1x128xf32>
    %56 = vector.shape_cast %55 : vector<1x1x128xf32> to vector<1x128xf32>
    %cst_35 = arith.constant dense<0.000000e+00> : vector<16xf32>
    %57 = vector.multi_reduction <add>, %52, %cst_35 [1] : vector<16x128xf32> to vector<16xf32>
    %58 = vector.shape_cast %57 : vector<16xf32> to vector<16x1xf32>
    %cst_36 = arith.constant 1.562500e-02 : f32
    %59 = vector.broadcast %cst_36 : f32 to vector<16x1xf32>
    %60 = arith.mulf %58, %59 : vector<16x1xf32>
    %61 = vector.broadcast %60 : vector<16x1xf32> to vector<16x128xf32>
    %62 = arith.subf %52, %61 : vector<16x128xf32>
    %63 = vector.broadcast %5 : vector<1x128xf32> to vector<16x128xf32>
    %64 = arith.mulf %62, %63 : vector<16x128xf32>
    %65 = arith.mulf %64, %64 : vector<16x128xf32>
    %cst_37 = arith.constant dense<0.000000e+00> : vector<16xf32>
    %66 = vector.multi_reduction <add>, %65, %cst_37 [1] : vector<16x128xf32> to vector<16xf32>
    %67 = vector.shape_cast %66 : vector<16xf32> to vector<16x1xf32>
    %cst_38 = arith.constant 1.562500e-02 : f32
    %68 = vector.broadcast %cst_38 : f32 to vector<16x1xf32>
    %69 = arith.mulf %67, %68 : vector<16x1xf32>
    %cst_39 = arith.constant 9.99999974E-6 : f32
    %70 = vector.broadcast %cst_39 : f32 to vector<16x1xf32>
    %71 = arith.addf %69, %70 : vector<16x1xf32>
    %72 = math.rsqrt %71 : vector<16x1xf32>
    %73 = vector.broadcast %72 : vector<16x1xf32> to vector<16x128xf32>
    %74 = arith.mulf %62, %73 : vector<16x128xf32>
    %75 = vector.broadcast %54 : vector<1x128xf32> to vector<16x128xf32>
    %76 = arith.mulf %74, %75 : vector<16x128xf32>
    %77 = vector.broadcast %56 : vector<1x128xf32> to vector<16x128xf32>
    %78 = arith.addf %76, %77 : vector<16x128xf32>
    %79 = arith.truncf %78 : vector<16x128xf32> to vector<16x128xbf16>
    %c0_40 = arith.constant 0 : index
    %c0_41 = arith.constant 0 : index
    %c0_42 = arith.constant 0 : index
    %80 = vector.load %arg11[%c0_40, %c0_41, %c0_42] : memref<2x128x128xbf16, #tpu.memory_space<vmem>>, vector<1x128x128xbf16>
    %81 = vector.shape_cast %80 : vector<1x128x128xbf16> to vector<128x128xbf16>
    %cst_43 = arith.constant dense<0.000000e+00> : vector<16x128xf32>
    %82 = tpu.matmul %79, %81, %cst_43 {dimension_numbers = #tpu.dot_dimension_numbers<[1], [0], [0], [1], [0, 0, 1, 1], [], []>} : vector<16x128xbf16>, vector<128x128xbf16>, vector<16x128xf32> -> vector<16x128xf32>
    %c0_44 = arith.constant 0 : index
    %c0_45 = arith.constant 0 : index
    %c0_46 = arith.constant 0 : index
    %83 = vector.load %arg12[%c0_44, %c0_45, %c0_46] : memref<2x1x128xf32, #tpu.memory_space<vmem>>, vector<1x1x128xf32>
    %84 = vector.shape_cast %83 : vector<1x1x128xf32> to vector<1x128xf32>
    %85 = vector.broadcast %84 : vector<1x128xf32> to vector<16x128xf32>
    %86 = arith.addf %82, %85 : vector<16x128xf32>
    %cst_47 = arith.constant 5.000000e-01 : f32
    %87 = vector.broadcast %cst_47 : f32 to vector<16x128xf32>
    %88 = arith.mulf %87, %86 : vector<16x128xf32>
    %cst_48 = arith.constant 0.707106769 : f32
    %89 = vector.broadcast %cst_48 : f32 to vector<16x128xf32>
    %90 = arith.mulf %86, %89 : vector<16x128xf32>
    %cst_49 = arith.constant 0.000000e+00 : f32
    %91 = vector.broadcast %cst_49 : f32 to vector<16x128xf32>
    %92 = arith.cmpf oge, %90, %91 : vector<16x128xf32>
    %cst_50 = arith.constant 1.000000e+00 : f32
    %cst_51 = arith.constant -1.000000e+00 : f32
    %93 = vector.broadcast %cst_50 : f32 to vector<16x128xf32>
    %94 = vector.broadcast %cst_51 : f32 to vector<16x128xf32>
    %95 = arith.select %92, %93, %94 : vector<16x128xi1>, vector<16x128xf32>
    %96 = math.absf %90 : vector<16x128xf32>
    %cst_52 = arith.constant 0.327591091 : f32
    %97 = vector.broadcast %cst_52 : f32 to vector<16x128xf32>
    %98 = arith.mulf %97, %96 : vector<16x128xf32>
    %cst_53 = arith.constant 1.000000e+00 : f32
    %99 = vector.broadcast %cst_53 : f32 to vector<16x128xf32>
    %100 = arith.addf %99, %98 : vector<16x128xf32>
    %cst_54 = arith.constant 1.000000e+00 : f32
    %101 = vector.broadcast %cst_54 : f32 to vector<16x128xf32>
    %102 = arith.divf %101, %100 : vector<16x128xf32>
    %cst_55 = arith.constant 1.06140542 : f32
    %103 = vector.broadcast %cst_55 : f32 to vector<16x128xf32>
    %104 = arith.mulf %103, %102 : vector<16x128xf32>
    %cst_56 = arith.constant -1.45315206 : f32
    %105 = vector.broadcast %cst_56 : f32 to vector<16x128xf32>
    %106 = arith.addf %104, %105 : vector<16x128xf32>
    %107 = arith.mulf %106, %102 : vector<16x128xf32>
    %cst_57 = arith.constant 1.42141378 : f32
    %108 = vector.broadcast %cst_57 : f32 to vector<16x128xf32>
    %109 = arith.addf %107, %108 : vector<16x128xf32>
    %110 = arith.mulf %109, %102 : vector<16x128xf32>
    %cst_58 = arith.constant -0.284496725 : f32
    %111 = vector.broadcast %cst_58 : f32 to vector<16x128xf32>
    %112 = arith.addf %110, %111 : vector<16x128xf32>
    %113 = arith.mulf %112, %102 : vector<16x128xf32>
    %cst_59 = arith.constant 0.254829586 : f32
    %114 = vector.broadcast %cst_59 : f32 to vector<16x128xf32>
    %115 = arith.addf %113, %114 : vector<16x128xf32>
    %116 = arith.mulf %115, %102 : vector<16x128xf32>
    %cst_60 = arith.constant 0.000000e+00 : f32
    %117 = vector.broadcast %cst_60 : f32 to vector<16x128xf32>
    %118 = arith.subf %117, %96 : vector<16x128xf32>
    %119 = arith.mulf %118, %96 : vector<16x128xf32>
    %120 = math.exp %119 : vector<16x128xf32>
    %121 = arith.mulf %116, %120 : vector<16x128xf32>
    %cst_61 = arith.constant 1.000000e+00 : f32
    %122 = vector.broadcast %cst_61 : f32 to vector<16x128xf32>
    %123 = arith.subf %122, %121 : vector<16x128xf32>
    %124 = arith.mulf %95, %123 : vector<16x128xf32>
    %cst_62 = arith.constant 1.000000e+00 : f32
    %125 = vector.broadcast %cst_62 : f32 to vector<16x128xf32>
    %126 = arith.addf %125, %124 : vector<16x128xf32>
    %127 = arith.mulf %88, %126 : vector<16x128xf32>
    %128 = arith.truncf %127 : vector<16x128xf32> to vector<16x128xbf16>
    %c0_63 = arith.constant 0 : index
    %c0_64 = arith.constant 0 : index
    %c0_65 = arith.constant 0 : index
    %129 = vector.load %arg13[%c0_63, %c0_64, %c0_65] : memref<2x128x128xbf16, #tpu.memory_space<vmem>>, vector<1x128x128xbf16>
    %130 = vector.shape_cast %129 : vector<1x128x128xbf16> to vector<128x128xbf16>
    %cst_66 = arith.constant dense<0.000000e+00> : vector<16x128xf32>
    %131 = tpu.matmul %128, %130, %cst_66 {dimension_numbers = #tpu.dot_dimension_numbers<[1], [0], [0], [1], [0, 0, 1, 1], [], []>} : vector<16x128xbf16>, vector<128x128xbf16>, vector<16x128xf32> -> vector<16x128xf32>
    %c0_67 = arith.constant 0 : index
    %c0_68 = arith.constant 0 : index
    %c0_69 = arith.constant 0 : index
    %132 = vector.load %arg14[%c0_67, %c0_68, %c0_69] : memref<2x1x128xf32, #tpu.memory_space<vmem>>, vector<1x1x128xf32>
    %133 = vector.shape_cast %132 : vector<1x1x128xf32> to vector<1x128xf32>
    %134 = vector.broadcast %133 : vector<1x128xf32> to vector<16x128xf32>
    %135 = arith.addf %131, %134 : vector<16x128xf32>
    %136 = arith.addf %78, %135 : vector<16x128xf32>
    %c0_70 = arith.constant 0 : index
    %c0_71 = arith.constant 0 : index
    %c0_72 = arith.constant 0 : index
    %137 = vector.load %arg15[%c0_70, %c0_71, %c0_72] : memref<2x1x128xf32, #tpu.memory_space<vmem>>, vector<1x1x128xf32>
    %138 = vector.shape_cast %137 : vector<1x1x128xf32> to vector<1x128xf32>
    %c0_73 = arith.constant 0 : index
    %c0_74 = arith.constant 0 : index
    %c0_75 = arith.constant 0 : index
    %139 = vector.load %arg16[%c0_73, %c0_74, %c0_75] : memref<2x1x128xf32, #tpu.memory_space<vmem>>, vector<1x1x128xf32>
    %140 = vector.shape_cast %139 : vector<1x1x128xf32> to vector<1x128xf32>
    %cst_76 = arith.constant dense<0.000000e+00> : vector<16xf32>
    %141 = vector.multi_reduction <add>, %136, %cst_76 [1] : vector<16x128xf32> to vector<16xf32>
    %142 = vector.shape_cast %141 : vector<16xf32> to vector<16x1xf32>
    %cst_77 = arith.constant 1.562500e-02 : f32
    %143 = vector.broadcast %cst_77 : f32 to vector<16x1xf32>
    %144 = arith.mulf %142, %143 : vector<16x1xf32>
    %145 = vector.broadcast %144 : vector<16x1xf32> to vector<16x128xf32>
    %146 = arith.subf %136, %145 : vector<16x128xf32>
    %147 = vector.broadcast %5 : vector<1x128xf32> to vector<16x128xf32>
    %148 = arith.mulf %146, %147 : vector<16x128xf32>
    %149 = arith.mulf %148, %148 : vector<16x128xf32>
    %cst_78 = arith.constant dense<0.000000e+00> : vector<16xf32>
    %150 = vector.multi_reduction <add>, %149, %cst_78 [1] : vector<16x128xf32> to vector<16xf32>
    %151 = vector.shape_cast %150 : vector<16xf32> to vector<16x1xf32>
    %cst_79 = arith.constant 1.562500e-02 : f32
    %152 = vector.broadcast %cst_79 : f32 to vector<16x1xf32>
    %153 = arith.mulf %151, %152 : vector<16x1xf32>
    %cst_80 = arith.constant 9.99999974E-6 : f32
    %154 = vector.broadcast %cst_80 : f32 to vector<16x1xf32>
    %155 = arith.addf %153, %154 : vector<16x1xf32>
    %156 = math.rsqrt %155 : vector<16x1xf32>
    %157 = vector.broadcast %156 : vector<16x1xf32> to vector<16x128xf32>
    %158 = arith.mulf %146, %157 : vector<16x128xf32>
    %159 = vector.broadcast %138 : vector<1x128xf32> to vector<16x128xf32>
    %160 = arith.mulf %158, %159 : vector<16x128xf32>
    %161 = vector.broadcast %140 : vector<1x128xf32> to vector<16x128xf32>
    %162 = arith.addf %160, %161 : vector<16x128xf32>
    %163 = arith.truncf %162 : vector<16x128xf32> to vector<16x128xbf16>
    %c1 = arith.constant 1 : index
    %c0_81 = arith.constant 0 : index
    %c0_82 = arith.constant 0 : index
    %164 = vector.load %arg5[%c1, %c0_81, %c0_82] : memref<2x128x384xbf16, #tpu.memory_space<vmem>>, vector<1x128x384xbf16>
    %165 = vector.shape_cast %164 : vector<1x128x384xbf16> to vector<128x384xbf16>
    %cst_83 = arith.constant dense<0.000000e+00> : vector<16x384xf32>
    %166 = tpu.matmul %163, %165, %cst_83 {dimension_numbers = #tpu.dot_dimension_numbers<[1], [0], [0], [1], [0, 0, 1, 1], [], []>} : vector<16x128xbf16>, vector<128x384xbf16>, vector<16x384xf32> -> vector<16x384xf32>
    %c1_84 = arith.constant 1 : index
    %c0_85 = arith.constant 0 : index
    %c0_86 = arith.constant 0 : index
    %167 = vector.load %arg6[%c1_84, %c0_85, %c0_86] : memref<2x1x384xf32, #tpu.memory_space<vmem>>, vector<1x1x384xf32>
    %168 = vector.shape_cast %167 : vector<1x1x384xf32> to vector<1x384xf32>
    %169 = vector.broadcast %168 : vector<1x384xf32> to vector<16x384xf32>
    %170 = arith.addf %166, %169 : vector<16x384xf32>
    %171 = vector.extract_strided_slice %170 {offsets = [0, 0], sizes = [16, 128], strides = [1, 1]} : vector<16x384xf32> to vector<16x128xf32>
    %cst_87 = arith.constant 0.353553385 : f32
    %172 = vector.broadcast %cst_87 : f32 to vector<16x128xf32>
    %173 = arith.mulf %171, %172 : vector<16x128xf32>
    %174 = vector.extract_strided_slice %170 {offsets = [0, 128], sizes = [16, 128], strides = [1, 1]} : vector<16x384xf32> to vector<16x128xf32>
    %175 = vector.extract_strided_slice %170 {offsets = [0, 256], sizes = [16, 128], strides = [1, 1]} : vector<16x384xf32> to vector<16x128xf32>
    %176 = tpu.concatenate %174, %174, %174, %174, %174, %174, %174, %174 in 0 : vector<16x128xf32>, vector<16x128xf32>, vector<16x128xf32>, vector<16x128xf32>, vector<16x128xf32>, vector<16x128xf32>, vector<16x128xf32>, vector<16x128xf32> -> vector<128x128xf32>
    %177 = arith.mulf %176, %7 : vector<128x128xf32>
    %178 = arith.truncf %177 : vector<128x128xf32> to vector<128x128xbf16>
    %179 = tpu.concatenate %175, %175, %175, %175, %175, %175, %175, %175 in 0 : vector<16x128xf32>, vector<16x128xf32>, vector<16x128xf32>, vector<16x128xf32>, vector<16x128xf32>, vector<16x128xf32>, vector<16x128xf32>, vector<16x128xf32> -> vector<128x128xf32>
    %180 = arith.mulf %179, %7 : vector<128x128xf32>
    %181 = arith.truncf %180 : vector<128x128xf32> to vector<128x128xbf16>
    %182 = arith.truncf %173 : vector<16x128xf32> to vector<16x128xbf16>
    %cst_88 = arith.constant dense<0.000000e+00> : vector<16x128xf32>
    %183 = tpu.matmul %182, %178, %cst_88 {dimension_numbers = #tpu.dot_dimension_numbers<[1], [1], [0], [0], [0, 0, 1, 0], [], []>} : vector<16x128xbf16>, vector<128x128xbf16>, vector<16x128xf32> -> vector<16x128xf32>
    %184 = arith.addf %183, %6 : vector<16x128xf32>
    %cst_89 = arith.constant dense<0xFF800000> : vector<16xf32>
    %185 = vector.multi_reduction <maximumf>, %184, %cst_89 [1] : vector<16x128xf32> to vector<16xf32>
    %186 = vector.shape_cast %185 : vector<16xf32> to vector<16x1xf32>
    %187 = vector.broadcast %186 : vector<16x1xf32> to vector<16x128xf32>
    %188 = arith.subf %184, %187 : vector<16x128xf32>
    %189 = math.exp %188 : vector<16x128xf32>
    %cst_90 = arith.constant dense<0.000000e+00> : vector<16x128xf32>
    %190 = tpu.matmul %189, %8, %cst_90 {dimension_numbers = #tpu.dot_dimension_numbers<[1], [0], [0], [1], [0, 0, 1, 1], [], []>} : vector<16x128xf32>, vector<128x128xf32>, vector<16x128xf32> -> vector<16x128xf32>
    %191 = tpu.reciprocal %190 {approx = true} : vector<16x128xf32> -> vector<16x128xf32>
    %192 = arith.mulf %189, %191 : vector<16x128xf32>
    %193 = arith.truncf %192 : vector<16x128xf32> to vector<16x128xbf16>
    %cst_91 = arith.constant dense<0.000000e+00> : vector<16x128xf32>
    %194 = tpu.matmul %193, %181, %cst_91 {dimension_numbers = #tpu.dot_dimension_numbers<[1], [0], [0], [1], [0, 0, 1, 1], [], []>} : vector<16x128xbf16>, vector<128x128xbf16>, vector<16x128xf32> -> vector<16x128xf32>
    %195 = arith.truncf %194 : vector<16x128xf32> to vector<16x128xbf16>
    %c1_92 = arith.constant 1 : index
    %c0_93 = arith.constant 0 : index
    %c0_94 = arith.constant 0 : index
    %196 = vector.load %arg7[%c1_92, %c0_93, %c0_94] : memref<2x128x128xbf16, #tpu.memory_space<vmem>>, vector<1x128x128xbf16>
    %197 = vector.shape_cast %196 : vector<1x128x128xbf16> to vector<128x128xbf16>
    %cst_95 = arith.constant dense<0.000000e+00> : vector<16x128xf32>
    %198 = tpu.matmul %195, %197, %cst_95 {dimension_numbers = #tpu.dot_dimension_numbers<[1], [0], [0], [1], [0, 0, 1, 1], [], []>} : vector<16x128xbf16>, vector<128x128xbf16>, vector<16x128xf32> -> vector<16x128xf32>
    %c1_96 = arith.constant 1 : index
    %c0_97 = arith.constant 0 : index
    %c0_98 = arith.constant 0 : index
    %199 = vector.load %arg8[%c1_96, %c0_97, %c0_98] : memref<2x1x128xf32, #tpu.memory_space<vmem>>, vector<1x1x128xf32>
    %200 = vector.shape_cast %199 : vector<1x1x128xf32> to vector<1x128xf32>
    %201 = vector.broadcast %200 : vector<1x128xf32> to vector<16x128xf32>
    %202 = arith.addf %198, %201 : vector<16x128xf32>
    %203 = arith.addf %162, %202 : vector<16x128xf32>
    %c1_99 = arith.constant 1 : index
    %c0_100 = arith.constant 0 : index
    %c0_101 = arith.constant 0 : index
    %204 = vector.load %arg9[%c1_99, %c0_100, %c0_101] : memref<2x1x128xf32, #tpu.memory_space<vmem>>, vector<1x1x128xf32>
    %205 = vector.shape_cast %204 : vector<1x1x128xf32> to vector<1x128xf32>
    %c1_102 = arith.constant 1 : index
    %c0_103 = arith.constant 0 : index
    %c0_104 = arith.constant 0 : index
    %206 = vector.load %arg10[%c1_102, %c0_103, %c0_104] : memref<2x1x128xf32, #tpu.memory_space<vmem>>, vector<1x1x128xf32>
    %207 = vector.shape_cast %206 : vector<1x1x128xf32> to vector<1x128xf32>
    %cst_105 = arith.constant dense<0.000000e+00> : vector<16xf32>
    %208 = vector.multi_reduction <add>, %203, %cst_105 [1] : vector<16x128xf32> to vector<16xf32>
    %209 = vector.shape_cast %208 : vector<16xf32> to vector<16x1xf32>
    %cst_106 = arith.constant 1.562500e-02 : f32
    %210 = vector.broadcast %cst_106 : f32 to vector<16x1xf32>
    %211 = arith.mulf %209, %210 : vector<16x1xf32>
    %212 = vector.broadcast %211 : vector<16x1xf32> to vector<16x128xf32>
    %213 = arith.subf %203, %212 : vector<16x128xf32>
    %214 = vector.broadcast %5 : vector<1x128xf32> to vector<16x128xf32>
    %215 = arith.mulf %213, %214 : vector<16x128xf32>
    %216 = arith.mulf %215, %215 : vector<16x128xf32>
    %cst_107 = arith.constant dense<0.000000e+00> : vector<16xf32>
    %217 = vector.multi_reduction <add>, %216, %cst_107 [1] : vector<16x128xf32> to vector<16xf32>
    %218 = vector.shape_cast %217 : vector<16xf32> to vector<16x1xf32>
    %cst_108 = arith.constant 1.562500e-02 : f32
    %219 = vector.broadcast %cst_108 : f32 to vector<16x1xf32>
    %220 = arith.mulf %218, %219 : vector<16x1xf32>
    %cst_109 = arith.constant 9.99999974E-6 : f32
    %221 = vector.broadcast %cst_109 : f32 to vector<16x1xf32>
    %222 = arith.addf %220, %221 : vector<16x1xf32>
    %223 = math.rsqrt %222 : vector<16x1xf32>
    %224 = vector.broadcast %223 : vector<16x1xf32> to vector<16x128xf32>
    %225 = arith.mulf %213, %224 : vector<16x128xf32>
    %226 = vector.broadcast %205 : vector<1x128xf32> to vector<16x128xf32>
    %227 = arith.mulf %225, %226 : vector<16x128xf32>
    %228 = vector.broadcast %207 : vector<1x128xf32> to vector<16x128xf32>
    %229 = arith.addf %227, %228 : vector<16x128xf32>
    %230 = arith.truncf %229 : vector<16x128xf32> to vector<16x128xbf16>
    %c1_110 = arith.constant 1 : index
    %c0_111 = arith.constant 0 : index
    %c0_112 = arith.constant 0 : index
    %231 = vector.load %arg11[%c1_110, %c0_111, %c0_112] : memref<2x128x128xbf16, #tpu.memory_space<vmem>>, vector<1x128x128xbf16>
    %232 = vector.shape_cast %231 : vector<1x128x128xbf16> to vector<128x128xbf16>
    %cst_113 = arith.constant dense<0.000000e+00> : vector<16x128xf32>
    %233 = tpu.matmul %230, %232, %cst_113 {dimension_numbers = #tpu.dot_dimension_numbers<[1], [0], [0], [1], [0, 0, 1, 1], [], []>} : vector<16x128xbf16>, vector<128x128xbf16>, vector<16x128xf32> -> vector<16x128xf32>
    %c1_114 = arith.constant 1 : index
    %c0_115 = arith.constant 0 : index
    %c0_116 = arith.constant 0 : index
    %234 = vector.load %arg12[%c1_114, %c0_115, %c0_116] : memref<2x1x128xf32, #tpu.memory_space<vmem>>, vector<1x1x128xf32>
    %235 = vector.shape_cast %234 : vector<1x1x128xf32> to vector<1x128xf32>
    %236 = vector.broadcast %235 : vector<1x128xf32> to vector<16x128xf32>
    %237 = arith.addf %233, %236 : vector<16x128xf32>
    %cst_117 = arith.constant 5.000000e-01 : f32
    %238 = vector.broadcast %cst_117 : f32 to vector<16x128xf32>
    %239 = arith.mulf %238, %237 : vector<16x128xf32>
    %cst_118 = arith.constant 0.707106769 : f32
    %240 = vector.broadcast %cst_118 : f32 to vector<16x128xf32>
    %241 = arith.mulf %237, %240 : vector<16x128xf32>
    %cst_119 = arith.constant 0.000000e+00 : f32
    %242 = vector.broadcast %cst_119 : f32 to vector<16x128xf32>
    %243 = arith.cmpf oge, %241, %242 : vector<16x128xf32>
    %cst_120 = arith.constant 1.000000e+00 : f32
    %cst_121 = arith.constant -1.000000e+00 : f32
    %244 = vector.broadcast %cst_120 : f32 to vector<16x128xf32>
    %245 = vector.broadcast %cst_121 : f32 to vector<16x128xf32>
    %246 = arith.select %243, %244, %245 : vector<16x128xi1>, vector<16x128xf32>
    %247 = math.absf %241 : vector<16x128xf32>
    %cst_122 = arith.constant 0.327591091 : f32
    %248 = vector.broadcast %cst_122 : f32 to vector<16x128xf32>
    %249 = arith.mulf %248, %247 : vector<16x128xf32>
    %cst_123 = arith.constant 1.000000e+00 : f32
    %250 = vector.broadcast %cst_123 : f32 to vector<16x128xf32>
    %251 = arith.addf %250, %249 : vector<16x128xf32>
    %cst_124 = arith.constant 1.000000e+00 : f32
    %252 = vector.broadcast %cst_124 : f32 to vector<16x128xf32>
    %253 = arith.divf %252, %251 : vector<16x128xf32>
    %cst_125 = arith.constant 1.06140542 : f32
    %254 = vector.broadcast %cst_125 : f32 to vector<16x128xf32>
    %255 = arith.mulf %254, %253 : vector<16x128xf32>
    %cst_126 = arith.constant -1.45315206 : f32
    %256 = vector.broadcast %cst_126 : f32 to vector<16x128xf32>
    %257 = arith.addf %255, %256 : vector<16x128xf32>
    %258 = arith.mulf %257, %253 : vector<16x128xf32>
    %cst_127 = arith.constant 1.42141378 : f32
    %259 = vector.broadcast %cst_127 : f32 to vector<16x128xf32>
    %260 = arith.addf %258, %259 : vector<16x128xf32>
    %261 = arith.mulf %260, %253 : vector<16x128xf32>
    %cst_128 = arith.constant -0.284496725 : f32
    %262 = vector.broadcast %cst_128 : f32 to vector<16x128xf32>
    %263 = arith.addf %261, %262 : vector<16x128xf32>
    %264 = arith.mulf %263, %253 : vector<16x128xf32>
    %cst_129 = arith.constant 0.254829586 : f32
    %265 = vector.broadcast %cst_129 : f32 to vector<16x128xf32>
    %266 = arith.addf %264, %265 : vector<16x128xf32>
    %267 = arith.mulf %266, %253 : vector<16x128xf32>
    %cst_130 = arith.constant 0.000000e+00 : f32
    %268 = vector.broadcast %cst_130 : f32 to vector<16x128xf32>
    %269 = arith.subf %268, %247 : vector<16x128xf32>
    %270 = arith.mulf %269, %247 : vector<16x128xf32>
    %271 = math.exp %270 : vector<16x128xf32>
    %272 = arith.mulf %267, %271 : vector<16x128xf32>
    %cst_131 = arith.constant 1.000000e+00 : f32
    %273 = vector.broadcast %cst_131 : f32 to vector<16x128xf32>
    %274 = arith.subf %273, %272 : vector<16x128xf32>
    %275 = arith.mulf %246, %274 : vector<16x128xf32>
    %cst_132 = arith.constant 1.000000e+00 : f32
    %276 = vector.broadcast %cst_132 : f32 to vector<16x128xf32>
    %277 = arith.addf %276, %275 : vector<16x128xf32>
    %278 = arith.mulf %239, %277 : vector<16x128xf32>
    %279 = arith.truncf %278 : vector<16x128xf32> to vector<16x128xbf16>
    %c1_133 = arith.constant 1 : index
    %c0_134 = arith.constant 0 : index
    %c0_135 = arith.constant 0 : index
    %280 = vector.load %arg13[%c1_133, %c0_134, %c0_135] : memref<2x128x128xbf16, #tpu.memory_space<vmem>>, vector<1x128x128xbf16>
    %281 = vector.shape_cast %280 : vector<1x128x128xbf16> to vector<128x128xbf16>
    %cst_136 = arith.constant dense<0.000000e+00> : vector<16x128xf32>
    %282 = tpu.matmul %279, %281, %cst_136 {dimension_numbers = #tpu.dot_dimension_numbers<[1], [0], [0], [1], [0, 0, 1, 1], [], []>} : vector<16x128xbf16>, vector<128x128xbf16>, vector<16x128xf32> -> vector<16x128xf32>
    %c1_137 = arith.constant 1 : index
    %c0_138 = arith.constant 0 : index
    %c0_139 = arith.constant 0 : index
    %283 = vector.load %arg14[%c1_137, %c0_138, %c0_139] : memref<2x1x128xf32, #tpu.memory_space<vmem>>, vector<1x1x128xf32>
    %284 = vector.shape_cast %283 : vector<1x1x128xf32> to vector<1x128xf32>
    %285 = vector.broadcast %284 : vector<1x128xf32> to vector<16x128xf32>
    %286 = arith.addf %282, %285 : vector<16x128xf32>
    %287 = arith.addf %229, %286 : vector<16x128xf32>
    %c1_140 = arith.constant 1 : index
    %c0_141 = arith.constant 0 : index
    %c0_142 = arith.constant 0 : index
    %288 = vector.load %arg15[%c1_140, %c0_141, %c0_142] : memref<2x1x128xf32, #tpu.memory_space<vmem>>, vector<1x1x128xf32>
    %289 = vector.shape_cast %288 : vector<1x1x128xf32> to vector<1x128xf32>
    %c1_143 = arith.constant 1 : index
    %c0_144 = arith.constant 0 : index
    %c0_145 = arith.constant 0 : index
    %290 = vector.load %arg16[%c1_143, %c0_144, %c0_145] : memref<2x1x128xf32, #tpu.memory_space<vmem>>, vector<1x1x128xf32>
    %291 = vector.shape_cast %290 : vector<1x1x128xf32> to vector<1x128xf32>
    %cst_146 = arith.constant dense<0.000000e+00> : vector<16xf32>
    %292 = vector.multi_reduction <add>, %287, %cst_146 [1] : vector<16x128xf32> to vector<16xf32>
    %293 = vector.shape_cast %292 : vector<16xf32> to vector<16x1xf32>
    %cst_147 = arith.constant 1.562500e-02 : f32
    %294 = vector.broadcast %cst_147 : f32 to vector<16x1xf32>
    %295 = arith.mulf %293, %294 : vector<16x1xf32>
    %296 = vector.broadcast %295 : vector<16x1xf32> to vector<16x128xf32>
    %297 = arith.subf %287, %296 : vector<16x128xf32>
    %298 = vector.broadcast %5 : vector<1x128xf32> to vector<16x128xf32>
    %299 = arith.mulf %297, %298 : vector<16x128xf32>
    %300 = arith.mulf %299, %299 : vector<16x128xf32>
    %cst_148 = arith.constant dense<0.000000e+00> : vector<16xf32>
    %301 = vector.multi_reduction <add>, %300, %cst_148 [1] : vector<16x128xf32> to vector<16xf32>
    %302 = vector.shape_cast %301 : vector<16xf32> to vector<16x1xf32>
    %cst_149 = arith.constant 1.562500e-02 : f32
    %303 = vector.broadcast %cst_149 : f32 to vector<16x1xf32>
    %304 = arith.mulf %302, %303 : vector<16x1xf32>
    %cst_150 = arith.constant 9.99999974E-6 : f32
    %305 = vector.broadcast %cst_150 : f32 to vector<16x1xf32>
    %306 = arith.addf %304, %305 : vector<16x1xf32>
    %307 = math.rsqrt %306 : vector<16x1xf32>
    %308 = vector.broadcast %307 : vector<16x1xf32> to vector<16x128xf32>
    %309 = arith.mulf %297, %308 : vector<16x128xf32>
    %310 = vector.broadcast %289 : vector<1x128xf32> to vector<16x128xf32>
    %311 = arith.mulf %309, %310 : vector<16x128xf32>
    %312 = vector.broadcast %291 : vector<1x128xf32> to vector<16x128xf32>
    %313 = arith.addf %311, %312 : vector<16x128xf32>
    %c0_151 = arith.constant 0 : index
    %c0_152 = arith.constant 0 : index
    %314 = vector.load %arg17[%c0_151, %c0_152] : memref<16x128xf32, #tpu.memory_space<vmem>>, vector<16x128xf32>
    tpu.vector_store %arg17[%c0_151, %c0_152], %313 {strides = array<i32>} : memref<16x128xf32, #tpu.memory_space<vmem>>, vector<16x128xf32>,
    return
  }
}

</mosaic_0001>

<bundles_post_ra>
// kernel: causal_transformer_forward.1
= control target key start
LH: loop header
LB: loop body
LE: loop exit
PB: predicated region body
PF: predicated region fallthrough
CT: control target
= control target key end

     0   :  { %s2956_s0 = inlined_call_operand.vmem [shape: f32[16,128], index: 0, kind: input, shape index: {}]   ;;  %s2957_s1 = inlined_call_operand.vmem [shape: f32[16,128], index: 1, kind: input, shape index: {}]   ;;  %s2958_s2 = inlined_call_operand.vmem [shape: f32[16,128], index: 2, kind: input, shape index: {}]   ;;  %s2959_s3 = inlined_call_operand.hbm [shape: f32[128,128], index: 3, kind: input, shape index: {}]   ;;  %s2960_s4 = inlined_call_operand.hbm [shape: f32[128,128], index: 4, kind: input, shape index: {}]   ;;  %s2961_s5 = inlined_call_operand.hbm [shape: bf16[2,128,384], index: 5, kind: input, shape index: {}]   ;;  %s2962_s6 = inlined_call_operand.vmem [shape: f32[2,1,384], index: 6, kind: input, shape index: {}]   ;;  %s2963_s7 = inlined_call_operand.hbm [shape: bf16[2,128,128], index: 7, kind: input, shape index: {}]   ;;  %s2964_s8 = inlined_call_operand.vmem [shape: f32[2,1,128], index: 8, kind: input, shape index: {}]   ;;  %s2965_s9 = inlined_call_operand.vmem [shape: f32[2,1,128], index: 9, kind: input, shape index: {}]   ;;  %s2966_s10 = inlined_call_operand.vmem [shape: f32[2,1,128], index: 10, kind: input, shape index: {}]   ;;  %s2967_s11 = inlined_call_operand.hbm [shape: bf16[2,128,128], index: 11, kind: input, shape index: {}]   ;;  %s2968_s12 = inlined_call_operand.vmem [shape: f32[2,1,128], index: 12, kind: input, shape index: {}]   ;;  %s2969_s13 = inlined_call_operand.hbm [shape: bf16[2,128,128], index: 13, kind: input, shape index: {}]   ;;  %s2970_s14 = inlined_call_operand.vmem [shape: f32[2,1,128], index: 14, kind: input, shape index: {}]   ;;  %s2971_s15 = inlined_call_operand.vmem [shape: f32[2,1,128], index: 15, kind: input, shape index: {}]   ;;  %s2972_s16 = inlined_call_operand.vmem [shape: f32[2,1,128], index: 16, kind: input, shape index: {}]   ;;  %s2973_s17 = inlined_call_operand.vmem [shape: f32[16,128], index: 17, kind: output, shape index: {}]  }
   0x1   :  { %2979 = sst [smem:[#allocation16_spill]] %s2956_s0 }
   0x2   :  { %2980 = sst [smem:[#allocation17_spill]] %s2957_s1 }
   0x3   :  { %2981 = sst [smem:[#allocation18_spill]] %s2973_s17 }
   0x4   :  { %22 = vsyncpa [#allocation3], 0 }
   0x5   :  { %23 = vsyncpa [#allocation5], 0 }
   0x6   :  { %24 = vsyncpa [#allocation8], 0 }
   0x7   :  { %25 = vsyncpa [#allocation11], 0  ;;  %s49_s26 = sshll.u32 %s2960_s4, 4  ;;  %s2488_s27 = smov [#allocation4]   ;;  %s50_s26 = int_to_ptr.hbm [resolvable:$true] %s49_s26 }
   0x8   :  { %s51_s28 = sshll.u32 %s2488_s27, 4  ;;  %s77_s30 = sshll.u32 %s2963_s7, 4  ;;  %s52_s28 = int_to_ptr.vmem [resolvable:$true] %s51_s28  ;;  %s78_s30 = int_to_ptr.hbm [resolvable:$true] %s77_s30 }
   0x9   :  { %s2489_s18 = smov 128   ;;  %s2490_s19 = smov 8  }
   0xa   :  { %57 = dma.hbm_to_vmem [thread:$0]  %s50_s26, 2048, %s52_s28, [#allocation5], %s2489_s18, %s2489_s18, %s2490_s19  }
   0xb   :  { %s2491_s1 = smov [#allocation7]   ;;  %s2977_s21 = smov 64  }
   0xc   :  { %s79_s20 = sshll.u32 %s2491_s1, 4  ;;  %s2493_s22 = smov 4   ;;  %s80_s20 = int_to_ptr.vmem [resolvable:$true] %s79_s20 }
   0xd   :  { %85 = dma.hbm_to_vmem [thread:$0]  %s78_s30, 2048, %s80_s20, [#allocation8], %s2977_s21, %s2977_s21, %s2493_s22  }
   0xe   :  { %s36_s24 = sshll.u32 %s2959_s3, 4  ;;  %s2494_s25 = smov [#allocation2]   ;;  %s37_s24 = int_to_ptr.hbm [resolvable:$true] %s36_s24 }
   0xf   :  { %s38_s7 = sshll.u32 %s2494_s25, 4  ;;  %s62_s28 = sshll.u32 %s2961_s5, 4  ;;  %s39_s7 = int_to_ptr.vmem [resolvable:$true] %s38_s7  ;;  %s63_s28 = int_to_ptr.hbm [resolvable:$true] %s62_s28 }
  0x10   :  { %44 = dma.hbm_to_vmem [thread:$0]  %s37_s24, 2048, %s39_s7, [#allocation3], %s2489_s18, %s2489_s18, %s2490_s19  }
  0x11   :  { %s2495_s29 = smov [#allocation6]   ;;  %s2496_s1 = smov 192  }
  0x12   :  { %s64_s0 = sshll.u32 %s2495_s29, 4  ;;  %s2497_s17 = smov 12   ;;  %s65_s0 = int_to_ptr.vmem [resolvable:$true] %s64_s0 }
  0x13   :  { %70 = dma.hbm_to_vmem [thread:$0]  %s63_s28, 6144, %s65_s0, [#allocation5], %s2496_s1, %s2496_s1, %s2497_s17  }
  0x14   :  { %s96_s3 = sshll.u32 %s2967_s11, 4  ;;  %s2498_s4 = smov [#allocation9]   ;;  %s97_s3 = int_to_ptr.hbm [resolvable:$true] %s96_s3 }
  0x15   :  { %s98_s23 = sshll.u32 %s2498_s4, 4  ;;  %s111_s5 = sshll.u32 %s2969_s13, 4  ;;  %s99_s23 = int_to_ptr.vmem [resolvable:$true] %s98_s23  ;;  %s112_s5 = int_to_ptr.hbm [resolvable:$true] %s111_s5 }
  0x16   :  { %s2982_s18 = smov 64   ;;  %s2499_s19 = smov [#allocation10]  }
  0x17   :  { %104 = dma.hbm_to_vmem [thread:$0]  %s97_s3, 2048, %s99_s23, [#allocation8], %s2982_s18, %s2982_s18, %s2493_s22  }
  0x18   :  { %s113_s24 = sshll.u32 %s2499_s19, 4  ;;  %s114_s24 = int_to_ptr.vmem [resolvable:$true] %s113_s24 }
  0x19   :  { %119 = dma.hbm_to_vmem [thread:$0]  %s112_s5, 2048, %s114_s24, [#allocation11], %s2982_s18, %s2982_s18, %s2493_s22  }
  0x1a   :  { %2480 = dma.done.wait [#allocation3], 2048  }
  0x1b   :  { %2481 = vsyncadd [#allocation3], 4294965248 }
  0x1c   :  { %2482 = dma.done.wait [#allocation5], 8192  }
  0x1d   :  { %2483 = vsyncadd [#allocation5], 4294959104 }
  0x1e   :  { %2484 = dma.done.wait [#allocation8], 4096  }
  0x1f   :  { %2485 = vsyncadd [#allocation8], 4294963200 }
  0x20   :  { %2486 = dma.done.wait [#allocation11], 2048  }
  0x21   :  { %2487 = vsyncadd [#allocation11], 4294965248  ;;  %v2167_v0 = vld [vmem:[#allocation6 + $0xac] sm:$0xf]  ;;  %v1842_v1 = vld [vmem:[#allocation6 + $0xb4] sm:$0xf0] }
  0x22   :  { %v2164_v2 = vld [vmem:[#allocation6 + $0x94] sm:$0xf]  ;;  %v1845_v3 = vor.u32 %v2167_v0, %v1842_v1  ;;  %v1830_v4 = vld [vmem:[#allocation6 + $0x9c] sm:$0xf0]  ;;  %v2161_v6 = vld [vmem:[#allocation6 + $0x7c] sm:$0xf] }
  0x23   :  { %v1833_v5 = vor.u32 %v2164_v2, %v1830_v4  ;;  %v1818_v7 = vld [vmem:[#allocation6 + $0x84] sm:$0xf0]  ;;  %v2168_v10 = vld [vmem:[#allocation6 + $0xb0] sm:$0xf0]  ;;  %v1828_v11 = vld [vmem:[#allocation6 + $0x90] sm:$0xf] }
  0x24   :  { %377 = vmatpush.bf16.msra.mxu1 %v1845_v3  ;;  %v1840_v8 = vld [vmem:[#allocation6 + $0xa8] sm:$0xf]  ;;  %v1821_v9 = vor.u32 %v2161_v6, %v1818_v7  ;;  %v2165_v12 = vld [vmem:[#allocation6 + $0x98] sm:$0xf0]  ;;  %v2158_v13 = vld [vmem:[#allocation6 + $0x64] sm:$0xf] }
  0x25   :  { %v1806_v14 = vld [vmem:[#allocation6 + $0x6c] sm:$0xf0]  ;;  %v1841_v15 = vor.u32 %v2168_v10, %v1840_v8  ;;  %v1829_v16 = vor.u32 %v2165_v12, %v1828_v11  ;;  %v2155_v18 = vld [vmem:[#allocation6 + $0x4c] sm:$0xf]  ;;  %v1816_v19 = vld [vmem:[#allocation6 + $0x78] sm:$0xf] }
  0x26   :  { %v1809_v17 = vor.u32 %v2158_v13, %v1806_v14  ;;  %v2162_v20 = vld [vmem:[#allocation6 + $0x80] sm:$0xf0]  ;;  %v1794_v21 = vld [vmem:[#allocation6 + $0x54] sm:$0xf0]  ;;  %v1804_v22 = vld [vmem:[#allocation6 + $0x60] sm:$0xf] }
  0x27   :  { %363 = vmatpush.bf16.msra.mxu0 %v1841_v15  ;;  %v2159_v23 = vld [vmem:[#allocation6 + $0x68] sm:$0xf0]  ;;  %v2152_v24 = vld [vmem:[#allocation6 + $0x34] sm:$0xf]  ;;  %v1782_v25 = vld [vmem:[#allocation6 + $0x3c] sm:$0xf0]  ;;  %v1817_v26 = vor.u32 %v2162_v20, %v1816_v19  ;;  %v1797_v27 = vor.u32 %v2155_v18, %v1794_v21 }
  0x28   :  { %378 = vmatpush.bf16.msra.mxu1 %v1833_v5  ;;  %v1805_v28 = vor.u32 %v2159_v23, %v1804_v22  ;;  %v1785_v29 = vor.u32 %v2152_v24, %v1782_v25  ;;  %v1792_v30 = vld [vmem:[#allocation6 + $0x48] sm:$0xf]  ;;  %v2156_v31 = vld [vmem:[#allocation6 + $0x50] sm:$0xf0]  ;;  %v2149_v32 = vld [vmem:[#allocation6 + $0x1c] sm:$0xf] }
  0x29   :  { %v1770_v33 = vld [vmem:[#allocation6 + $0x24] sm:$0xf0]  ;;  %s2983_s17 = sld [smem:[#allocation16_spill]]  ;;  %v1793_v37 = vor.u32 %v2156_v31, %v1792_v30  ;;  %v1780_v40 = vld [vmem:[#allocation6 + $0x30] sm:$0xf]  ;;  %v2649_v61 = vld [vmem:[#allocation2 + $0x78] sm:$0xff] }
  0x2a   :  { %s2984_s26 = sld [smem:[#allocation17_spill]]  ;;  %v1773_v38 = vor.u32 %v2149_v32, %v1770_v33  ;;  %v2153_v41 = vld [vmem:[#allocation6 + $0x38] sm:$0xf0]  ;;  %v2146_v42 = vld [vmem:[#allocation6 + $0x4] sm:$0xf]  ;;  %v2647_v60 = vld [vmem:[#allocation2 + $0x70] sm:$0xff] }
  0x2b   :  { %364 = vmatpush.bf16.msra.mxu0 %v1829_v16  ;;  %v1758_v43 = vld [vmem:[#allocation6 + $0xc] sm:$0xf0]  ;;  %v1781_v46 = vor.u32 %v2153_v41, %v1780_v40  ;;  %v1768_v48 = vld [vmem:[#allocation6 + $0x18] sm:$0xf]  ;;  %v2150_v49 = vld [vmem:[#allocation6 + $0x20] sm:$0xf0] }
  0x2c   :  { %379 = vmatpush.bf16.msra.mxu1 %v1821_v9  ;;  %v1761_v47 = vor.u32 %v2146_v42, %v1758_v43  ;;  %v1769_v51 = vor.u32 %v2150_v49, %v1768_v48  ;;  %v1756_v52 = vld [vmem:[#allocation6] sm:$0xf]  ;;  %v2147_v53 = vld [vmem:[#allocation6 + $0x8] sm:$0xf0]  ;;  %v2659_v7 = vld [vmem:[#allocation2 + $0x58] sm:$0xff]  ;;  %s2985_s13 = sld [smem:[#allocation18_spill]] }
  0x2d   :  { %v1757_v54 = vor.u32 %v2147_v53, %v1756_v52  ;;  %v2644_v55 = vld [vmem:[%s2962_s6] sm:$0x7]  ;;  %v2653_v2 = vld [vmem:[#allocation2 + $0x68] sm:$0xff]  ;;  %v2661_v8 = vld [vmem:[#allocation2 + $0x50] sm:$0xff] }
  0x2e   :  { %v230_v57 = vperm.slane %v2644_v55, 1  ;;  %v2655_v3 = vld [vmem:[#allocation2 + $0x60] sm:$0xff]  ;;  %v2665_v12 = vld [vmem:[#allocation2 + $0x48] sm:$0xff]  ;;  %v2673_v18 = vld [vmem:[#allocation2 + $0x30] sm:$0xff] }
  0x2f   :  { %365 = vmatpush.bf16.msra.mxu0 %v1817_v26  ;;  %v188_v34 = vld [vmem:[%s2983_s17] sm:$0xff]  ;;  %v189_v35 = vld [vmem:[%s2983_s17 + $0x8] sm:$0xff]  ;;  %v2169_v48 = vld [vmem:[#allocation6 + $0xb8] sm:$0xf0] }
  0x30   :  { %380 = vmatpush.bf16.msra.mxu1 %v1809_v17  ;;  %v190_v36 = vld [vmem:[%s2984_s26] sm:$0xff]  ;;  %v191_v39 = vld [vmem:[%s2984_s26 + $0x8] sm:$0xff]  ;;  %v2671_v17 = vld [vmem:[#allocation2 + $0x38] sm:$0xff] }
  0x31   :  { %v2631_v44 = vadd.f32 %v190_v36, %v188_v34  ;;  %v2633_v45 = vadd.f32 %v191_v39, %v189_v35  ;;  %v2667_v13 = vld [vmem:[#allocation2 + $0x40] sm:$0xff]  ;;  %v2677_v22 = vld [vmem:[#allocation2 + $0x28] sm:$0xff]  ;;  %v229_v34 = vperm.slane %v2644_v55, 0  ;;  %v1836_v49 = vld [vmem:[#allocation6 + $0x98] sm:$0xf] }
  0x32   :  { %v2679_v23 = vld [vmem:[#allocation2 + $0x20] sm:$0xff]  ;;  %v2689_v33 = vld [vmem:[#allocation2 + $0x8] sm:$0xff] }
  0x33   :  { %366 = vmatpush.bf16.msra.mxu0 %v1805_v28  ;;  %v2637_v50 = vpack.c.bf16 %v2633_v45, %v2631_v44  ;;  %v2692_v35 = vld [vmem:[#allocation2] sm:$0xff] }
  0x34   :  { %381 = vmatpush.bf16.msra.mxu1 %v1797_v27  ;;  %v2683_v27 = vld [vmem:[#allocation2 + $0x18] sm:$0xff]  ;;  %v2166_v52 = vld [vmem:[#allocation6 + $0xa0] sm:$0xf0] }
  0x35   :  { %v1837_v53 = vor.u32 %v2166_v52, %v1836_v49 }
  0x37   :  { %367 = vmatpush.bf16.msra.mxu0 %v1793_v37 }
  0x38   :  { %382 = vmatpush.bf16.msra.mxu1 %v1785_v29  ;;  %v2685_v29 = vld [vmem:[#allocation2 + $0x10] sm:$0xff] }
  0x3b   :  { %368 = vmatpush.bf16.msra.mxu0 %v1781_v46 }
  0x3c   :  { %383 = vmatpush.bf16.msra.mxu1 %v1773_v38 }
  0x3f   :  { %369 = vmatpush.bf16.msra.mxu0 %v1769_v51 }
  0x40   :  { %384 = vmatpush.bf16.msra.mxu1 %v1761_v47  ;;  %v1848_v47 = vld [vmem:[#allocation6 + $0xb0] sm:$0xf] }
  0x41   :  { %v1849_v51 = vor.u32 %v2169_v48, %v1848_v47  ;;  %v2745_v47 = vld [vmem:[#allocation4 + $0x8] sm:$0xff] }
  0x43   :  { %385 = vmatmul.bf16.vlgmr.msra.gmra.mxu1 %v2637_v50  ;;  %370 = vmatpush.bf16.msra.mxu0 %v1757_v54  ;;  %v1824_v54 = vld [vmem:[#allocation6 + $0x80] sm:$0xf] }
  0x44   :  { %391 = vmatpush.bf16.msra.mxu2 %v1849_v51 }
  0x46   :  { %371 = vmatmul.bf16.vlgmr.msra.gmra.mxu0 %v2637_v50 }
  0x48   :  { %392 = vmatpush.bf16.msra.mxu2 %v1837_v53 }
  0xc0   :  { %v386_v56 = vpop.f32.mrf.mxu1 }
  0xc1   :  { %v387_v58 = vadd.f32 %v386_v56, %v230_v57  ;;  %v2163_v56 = vld [vmem:[#allocation6 + $0x88] sm:$0xf0] }
  0xc3   :  { %v421_v63 = vmul.f32 %v387_v58, %v2647_v60  ;;  %v419_v5 = vmul.f32 %v387_v58, %v2655_v3  ;;  %v417_v10 = vmul.f32 %v387_v58, %v2661_v8  ;;  %v415_v15 = vmul.f32 %v387_v58, %v2667_v13  ;;  %v372_v28 = vpop.f32.mrf.mxu0 }
  0xc4   :  { %v413_v20 = vmul.f32 %v387_v58, %v2673_v18  ;;  %v411_v25 = vmul.f32 %v387_v58, %v2679_v23  ;;  %v409_v31 = vmul.f32 %v387_v58, %v2685_v29  ;;  %v407_v38 = vmul.f32 %v387_v58, %v2692_v35  ;;  %v2698_v58 = vld [vmem:[#allocation4 + $0x70] sm:$0xff] }
  0xc5   :  { %v373_v39 = vadd.f32 %v372_v28, %v229_v34 }
  0xc7   :  { %v405_v42 = vmul.f32 0.35355338, %v373_v39 }
  0xc8   :  { %v388_v59 = vpop.f32.mrf.mxu1 }
  0xc9   :  { %v389_v62 = vadd.f32 %v388_v59, %v230_v57  ;;  %v2696_v57 = vld [vmem:[#allocation4 + $0x78] sm:$0xff]  ;;  %v1825_v59 = vor.u32 %v2163_v56, %v1824_v54 }
  0xca   :  { %480 = vmatpush.msrb.mxu0 %v2696_v57 }
  0xcb   :  { %v422_v0 = vmul.f32 %v389_v62, %v2649_v61  ;;  %v420_v4 = vmul.f32 %v389_v62, %v2653_v2  ;;  %v418_v9 = vmul.f32 %v389_v62, %v2659_v7  ;;  %v416_v14 = vmul.f32 %v389_v62, %v2665_v12  ;;  %v374_v36 = vpop.f32.mrf.mxu0  ;;  %393 = vmatpush.bf16.msra.mxu2 %v1825_v59 }
  0xcc   :  { %v414_v19 = vmul.f32 %v389_v62, %v2671_v17  ;;  %v412_v24 = vmul.f32 %v389_v62, %v2677_v22  ;;  %v410_v30 = vmul.f32 %v389_v62, %v2683_v27  ;;  %v408_v37 = vmul.f32 %v389_v62, %v2689_v33  ;;  %v2701_v62 = vld [vmem:[#allocation4 + $0x68] sm:$0xff]  ;;  %481 = vmatpush.msrb.mxu0 %v2698_v58 }
  0xcd   :  { %v430_v1 = vpack.c.bf16 %v422_v0, %v421_v63  ;;  %v429_v6 = vpack.c.bf16 %v420_v4, %v419_v5  ;;  %v428_v11 = vpack.c.bf16 %v418_v9, %v417_v10  ;;  %v427_v16 = vpack.c.bf16 %v416_v14, %v415_v15  ;;  %v1812_v63 = vld [vmem:[#allocation6 + $0x68] sm:$0xf]  ;;  %v2160_v0 = vld [vmem:[#allocation6 + $0x70] sm:$0xf0]  ;;  %v2707_v5 = vld [vmem:[#allocation4 + $0x58] sm:$0xff] }
  0xce   :  { %v426_v21 = vpack.c.bf16 %v414_v19, %v413_v20  ;;  %v425_v26 = vpack.c.bf16 %v412_v24, %v411_v25  ;;  %v424_v32 = vpack.c.bf16 %v410_v30, %v409_v31  ;;  %v375_v40 = vadd.f32 %v374_v36, %v229_v34  ;;  %482 = vmatpush.msrb.mxu0 %v2701_v62  ;;  %v2157_v9 = vld [vmem:[#allocation6 + $0x58] sm:$0xf0]  ;;  %v2710_v10 = vld [vmem:[#allocation4 + $0x50] sm:$0xff]  ;;  %v2713_v14 = vld [vmem:[#allocation4 + $0x48] sm:$0xff] }
  0xcf   :  { %456 = vmatpush.bf16.xpose.msra.mxu3 %v430_v1  ;;  %v423_v41 = vpack.c.bf16 %v408_v37, %v407_v38  ;;  %v2704_v1 = vld [vmem:[#allocation4 + $0x60] sm:$0xff]  ;;  %v1813_v4 = vor.u32 %v2160_v0, %v1812_v63  ;;  %v1788_v15 = vld [vmem:[#allocation6 + $0x38] sm:$0xf]  ;;  %v2725_v30 = vld [vmem:[#allocation4 + $0x30] sm:$0xff]  ;;  %v231_v0 = vperm.slane %v2644_v55, 2 }
  0xd0   :  { %v406_v43 = vmul.f32 0.35355338, %v375_v40  ;;  %483 = vmatpush.msrb.mxu0 %v2704_v1  ;;  %v2716_v19 = vld [vmem:[#allocation4 + $0x40] sm:$0xff]  ;;  %v2722_v24 = vld [vmem:[#allocation4 + $0x38] sm:$0xff]  ;;  %v1764_v34 = vld [vmem:[#allocation6 + $0x8] sm:$0xf] }
  0xd1   :  { %394 = vmatpush.bf16.msra.mxu2 %v1813_v4  ;;  %v154_v20 = vld [vmem:[%s2958_s2] sm:$0xff]  ;;  %v2148_v36 = vld [vmem:[#allocation6 + $0x10] sm:$0xf0]  ;;  %v155_v37 = vld [vmem:[%s2958_s2 + $0x8] sm:$0xff] }
  0xd2   :  { %v455_v46 = vpack.c.bf16 %v406_v43, %v405_v42  ;;  %484 = vmatpush.msrb.mxu0 %v2707_v5  ;;  %v1776_v25 = vld [vmem:[#allocation6 + $0x20] sm:$0xf]  ;;  %v1765_v38 = vor.u32 %v2148_v36, %v1764_v34  ;;  %v2739_v43 = vld [vmem:[#allocation4 + $0x18] sm:$0xff] }
  0xd3   :  { %v2736_v42 = vld [vmem:[#allocation4 + $0x20] sm:$0xff] }
  0xd4   :  { %485 = vmatpush.msrb.mxu0 %v2710_v10 }
  0xd6   :  { %486 = vmatpush.msrb.mxu0 %v2713_v14 }
  0xd7   :  { %457 = vmatpush.bf16.xpose.msra.mxu3 %v429_v6  ;;  %v1800_v6 = vld [vmem:[#allocation6 + $0x50] sm:$0xf] }
  0xd8   :  { %487 = vmatpush.msrb.mxu0 %v2716_v19 }
  0xda   :  { %488 = vmatpush.msrb.mxu0 %v2722_v24 }
  0xdc   :  { %489 = vmatpush.msrb.mxu0 %v2725_v30 }
  0xdf   :  { %458 = vmatpush.bf16.xpose.msra.mxu3 %v428_v11  ;;  %v1801_v11 = vor.u32 %v2157_v9, %v1800_v6 }
  0xe1   :  { %395 = vmatpush.bf16.msra.mxu2 %v1801_v11 }
  0xe7   :  { %459 = vmatpush.bf16.xpose.msra.mxu3 %v427_v16  ;;  %v2154_v16 = vld [vmem:[#allocation6 + $0x40] sm:$0xf0] }
  0xef   :  { %460 = vmatpush.bf16.xpose.msra.mxu3 %v426_v21  ;;  %v1789_v21 = vor.u32 %v2154_v16, %v1788_v15 }
  0xf1   :  { %396 = vmatpush.bf16.msra.mxu2 %v1789_v21 }
  0xf7   :  { %461 = vmatpush.bf16.xpose.msra.mxu3 %v425_v26  ;;  %v2151_v26 = vld [vmem:[#allocation6 + $0x28] sm:$0xf0] }
  0xff   :  { %462 = vmatpush.bf16.xpose.msra.mxu3 %v424_v32  ;;  %v1777_v32 = vor.u32 %v2151_v26, %v1776_v25 }
 0x101   :  { %397 = vmatpush.bf16.msra.mxu2 %v1777_v32 }
 0x105   :  { %398 = vmatpush.bf16.msra.mxu2 %v1765_v38  ;;  %v2177_v38 = vld [vmem:[#allocation7 + $0x38] sm:$0xff] }
 0x107   :  { %463 = vmatpush.bf16.xpose.msra.mxu3 %v423_v41  ;;  %v2733_v41 = vld [vmem:[#allocation4 + $0x28] sm:$0xff] }
 0x108   :  { %399 = vmatmul.bf16.vlgmr.msra.gmra.mxu2 %v2637_v50  ;;  %490 = vmatpush.msrb.mxu0 %v2733_v41  ;;  %v2748_v50 = vld [vmem:[#allocation4] sm:$0xff] }
 0x109   :  { %591 = vmatpush.bf16.msrb.mxu2 %v2177_v38  ;;  %v2178_v38 = vld [vmem:[#allocation9] sm:$0xff] }
 0x10a   :  { %491 = vmatpush.msrb.mxu0 %v2736_v42 }
 0x10c   :  { %492 = vmatpush.msrb.mxu0 %v2739_v43 }
 0x10e   :  { %464 = vmatmul.bf16.vlgmr.msra.gmra.mxu3 %v455_v46  ;;  %v2741_v46 = vld [vmem:[#allocation4 + $0x10] sm:$0xff] }
 0x10f   :  { %493 = vmatpush.msrb.mxu0 %v2741_v46 }
 0x111   :  { %494 = vmatpush.msrb.mxu0 %v2745_v47 }
 0x113   :  { %495 = vmatpush.msrb.mxu0 %v2748_v50 }
 0x18b   :  { %v400_v63 = vpop.f32.mrf.mxu2 }
 0x18c   :  { %v401_v4 = vadd.f32 %v400_v63, %v231_v0 }
 0x18e   :  { %v445_v11 = vmul.f32 %v401_v4, %v2647_v60  ;;  %v443_v16 = vmul.f32 %v401_v4, %v2655_v3  ;;  %v441_v26 = vmul.f32 %v401_v4, %v2661_v8  ;;  %v435_v34 = vmul.f32 %v401_v4, %v2679_v23  ;;  %v2176_v23 = vld [vmem:[#allocation7 + $0x30] sm:$0xff] }
 0x18f   :  { %v433_v36 = vmul.f32 %v401_v4, %v2685_v29  ;;  %592 = vmatpush.bf16.msrb.mxu2 %v2176_v23  ;;  %v2173_v29 = vld [vmem:[#allocation7 + $0x18] sm:$0xff] }
 0x191   :  { %v465_v28 = vpop.f32.mrf.mxu3 }
 0x192   :  { %v466_v31 = vadd.f32 %v465_v28, %v154_v20 }
 0x193   :  { %v402_v6 = vpop.f32.mrf.mxu2 }
 0x194   :  { %470 = vmax.xlane.f32.xlu0 %v466_v31  ;;  %v403_v9 = vadd.f32 %v402_v6, %v231_v0  ;;  %v2256_v6 = vld [vmem:[%s2964_s8] ss:$0 sm:$0xff] }
 0x196   :  { %v446_v15 = vmul.f32 %v403_v9, %v2649_v61  ;;  %v444_v20 = vmul.f32 %v403_v9, %v2653_v2  ;;  %v442_v28 = vmul.f32 %v403_v9, %v2659_v7  ;;  %v440_v32 = vmul.f32 %v403_v9, %v2665_v12 }
 0x197   :  { %v437_v61 = vmul.f32 %v401_v4, %v2673_v18  ;;  %v438_v3 = vmul.f32 %v403_v9, %v2671_v17  ;;  %v436_v8 = vmul.f32 %v403_v9, %v2677_v22  ;;  %v432_v18 = vmul.f32 %v403_v9, %v2689_v33  ;;  %v2175_v22 = vld [vmem:[#allocation7 + $0x28] sm:$0xff] }
 0x198   :  { %v454_v21 = vpack.c.bf16 %v446_v15, %v445_v11  ;;  %v453_v25 = vpack.c.bf16 %v444_v20, %v443_v16  ;;  %v452_v55 = vpack.c.bf16 %v442_v28, %v441_v26  ;;  %593 = vmatpush.bf16.msrb.mxu2 %v2175_v22  ;;  %v150_v20 = vlaneseq }
 0x199   :  { %v467_v39 = vpop.f32.mrf.mxu3  ;;  %v450_v2 = vpack.c.bf16 %v438_v3, %v437_v61  ;;  %v449_v7 = vpack.c.bf16 %v436_v8, %v435_v34  ;;  %v2500_v28 = vmov 0.0   ;;  %v2185_v34 = vld [vmem:[#allocation9 + $0x38] sm:$0xff]  ;;  %v2184_v8 = vld [vmem:[#allocation9 + $0x30] sm:$0xff] }
 0x19a   :  { %v468_v40 = vadd.f32 %v467_v39, %v155_v37  ;;  %508 = vmatpush.bf16.msrb.mxu1 %v454_v21  ;;  %v431_v37 = vmul.f32 %v401_v4, %v2692_v35  ;;  %v2174_v39 = vld [vmem:[#allocation7 + $0x20] sm:$0xff]  ;;  %v151_v21 = vand.u32 127, %v150_v20  ;;  %730 = vmatpush.bf16.msra.mxu0 %v2185_v34 }
 0x19c   :  { %472 = vmax.xlane.f32.xlu0 %v468_v40  ;;  %v447_v17 = vpack.c.bf16 %v432_v18, %v431_v37  ;;  %594 = vmatpush.bf16.msrb.mxu2 %v2174_v39  ;;  %vm152_vm0 = vcmp.lt.s32.totalorder %v151_v21, 64  ;;  %v2179_v37 = vld [vmem:[#allocation9 + $0x8] sm:$0xff] }
 0x19e   :  { %509 = vmatpush.bf16.msrb.mxu1 %v453_v25  ;;  %731 = vmatpush.bf16.msra.mxu0 %v2184_v8  ;;  %v2191_v8 = vld [vmem:[#allocation10 + $0x28] sm:$0xff] }
 0x1a0   :  { %595 = vmatpush.bf16.msrb.mxu2 %v2173_v29 }
 0x1a2   :  { %510 = vmatpush.bf16.msrb.mxu1 %v452_v55  ;;  %v2773_v55 = vsel %vm152_vm0, 1.0, %v2500_v28 }
 0x207   :  { %v471_v48 = vpop.xlane.xlu0 %470 }
 0x208   :  { %v474_v49 = vsub.f32 %v466_v31, %v471_v48  ;;  %v439_v31 = vmul.f32 %v401_v4, %v2667_v13  ;;  %v434_v13 = vmul.f32 %v403_v9, %v2683_v27 }
 0x20a   :  { %v476_v51 = vmul.f32 1.442695, %v474_v49  ;;  %v451_v60 = vpack.c.bf16 %v440_v32, %v439_v31  ;;  %v448_v12 = vpack.c.bf16 %v434_v13, %v433_v36  ;;  %v2182_v36 = vld [vmem:[#allocation9 + $0x20] sm:$0xff]  ;;  %v2181_v13 = vld [vmem:[#allocation9 + $0x18] sm:$0xff] }
 0x20c   :  { %2270 = vpow2.f32 %v476_v51  ;;  %511 = vmatpush.bf16.msrb.mxu1 %v451_v60 }
 0x20f   :  { %v473_v52 = vpop.xlane.xlu0 %472 }
 0x210   :  { %v475_v53 = vsub.f32 %v468_v40, %v473_v52  ;;  %512 = vmatpush.bf16.msrb.mxu1 %v450_v2  ;;  %v2172_v52 = vld [vmem:[#allocation7 + $0x10] sm:$0xff] }
 0x211   :  { %596 = vmatpush.bf16.msrb.mxu2 %v2172_v52 }
 0x212   :  { %v2271_v54 = vpop.eup %2270  ;;  %v478_v56 = vmul.f32 1.442695, %v475_v53  ;;  %v2171_v53 = vld [vmem:[#allocation7 + $0x8] sm:$0xff] }
 0x213   :  { %496 = vmatmul.f32.vlgmr.msrb.gmra.mxu0 %v2271_v54 }
 0x214   :  { %2272 = vpow2.f32 %v478_v56  ;;  %513 = vmatpush.bf16.msrb.mxu1 %v449_v7  ;;  %v2170_v56 = vld [vmem:[#allocation7] sm:$0xff]  ;;  %v2183_v7 = vld [vmem:[#allocation9 + $0x28] sm:$0xff] }
 0x215   :  { %597 = vmatpush.bf16.msrb.mxu2 %v2171_v53  ;;  %732 = vmatpush.bf16.msra.mxu0 %v2183_v7 }
 0x218   :  { %514 = vmatpush.bf16.msrb.mxu1 %v448_v12  ;;  %v2180_v12 = vld [vmem:[#allocation9 + $0x10] sm:$0xff] }
 0x219   :  { %598 = vmatpush.bf16.msrb.mxu2 %v2170_v56  ;;  %733 = vmatpush.bf16.msra.mxu0 %v2182_v36 }
 0x21a   :  { %v2273_v59 = vpop.eup %2272 }
 0x21b   :  { %499 = vmatmul.f32.gmra.mxu0 %v2273_v59 }
 0x21c   :  { %515 = vmatpush.bf16.msrb.mxu1 %v447_v17 }
 0x21d   :  { %734 = vmatpush.bf16.msra.mxu0 %v2181_v13  ;;  %v2190_v13 = vld [vmem:[#allocation10 + $0x20] sm:$0xff] }
 0x221   :  { %735 = vmatpush.bf16.msra.mxu0 %v2180_v12 }
 0x225   :  { %736 = vmatpush.bf16.msra.mxu0 %v2179_v37 }
 0x229   :  { %737 = vmatpush.bf16.msra.mxu0 %v2178_v38  ;;  %v2189_v38 = vld [vmem:[#allocation10 + $0x18] sm:$0xff] }
 0x290   :  { %v497_v40 = vpop.f32.mrf.mxu0 }
 0x291   :  { %2274 = vrcp.f32 %v497_v40 }
 0x297   :  { %v2275_v35 = vpop.eup %2274 }
 0x298   :  { %v500_v27 = vpop.f32.mrf.mxu0  ;;  %v505_v33 = vmul.f32 %v2275_v35, %v2271_v54 }
 0x299   :  { %2276 = vrcp.f32 %v500_v27 }
 0x29f   :  { %v2277_v48 = vpop.eup %2276 }
 0x2a0   :  { %v506_v49 = vmul.f32 %v2277_v48, %v2273_v59 }
 0x2a2   :  { %v507_v51 = vpack.c.bf16 %v506_v49, %v505_v33 }
 0x2a4   :  { %516 = vmatmul.bf16.vlgmr.msrb.gmra.mxu1 %v507_v51 }
 0x321   :  { %v517_v63 = vpop.f32.mrf.mxu1 }
 0x329   :  { %v519_v0 = vpop.f32.mrf.mxu1 }
 0x32a   :  { %v522_v4 = vpack.c.bf16 %v519_v0, %v517_v63 }
 0x32c   :  { %599 = vmatmul.bf16.vlgmr.msrb.gmra.mxu2 %v522_v4 }
 0x3af   :  { %v600_v9 = vpop.f32.mrf.mxu2 }
 0x3b0   :  { %v601_v11 = vadd.f32 %v2256_v6, %v600_v9 }
 0x3b2   :  { %v605_v54 = vadd.f32 %v601_v11, %v2631_v44 }
 0x3b4   :  { %609 = vadd.xlane.f32.xlu1 %v605_v54 }
 0x3b7   :  { %v602_v59 = vpop.f32.mrf.mxu2 }
 0x3b8   :  { %v603_v15 = vadd.f32 %v2256_v6, %v602_v59  ;;  %v2257_v6 = vld [vmem:[%s2965_s9] ss:$0 sm:$0xff] }
 0x3ba   :  { %v606_v16 = vadd.f32 %v603_v15, %v2633_v45  ;;  %v2258_v15 = vld [vmem:[%s2966_s10] ss:$0 sm:$0xff] }
 0x3bc   :  { %611 = vadd.xlane.f32.xlu1 %v606_v16 }
 0x427   :  { %v610_v25 = vpop.xlane.xlu1 %609 }
 0x428   :  { %v613_v26 = vmul.f32 0.015625, %v610_v25 }
 0x42a   :  { %v615_v31 = vsub.f32 %v605_v54, %v613_v26  ;;  %v2259_v26 = vld [vmem:[%s2968_s12] ss:$0 sm:$0xff] }
 0x42c   :  { %v617_v32 = vmul.f32 %v615_v31, %v2773_v55 }
 0x42e   :  { %v619_v60 = vmul.f32 %v617_v32, %v617_v32 }
 0x42f   :  { %v612_v61 = vpop.xlane.xlu1 %611 }
 0x430   :  { %v614_v44 = vmul.f32 0.015625, %v612_v61  ;;  %621 = vadd.xlane.f32.xlu2 %v619_v60  ;;  %v2193_v60 = vld [vmem:[#allocation10 + $0x38] sm:$0xff] }
 0x431   :  { %893 = vmatpush.bf16.msra.mxu1 %v2193_v60 }
 0x432   :  { %v616_v3 = vsub.f32 %v606_v16, %v614_v44 }
 0x434   :  { %v618_v2 = vmul.f32 %v616_v3, %v2773_v55 }
 0x436   :  { %v620_v45 = vmul.f32 %v618_v2, %v618_v2 }
 0x438   :  { %623 = vadd.xlane.f32.xlu2 %v620_v45 }
 0x4a3   :  { %v622_v18 = vpop.xlane.xlu2 %621 }
 0x4a4   :  { %v625_v17 = vmul.f32 0.015625, %v622_v18 }
 0x4a6   :  { %v627_v23 = vadd.f32 1e-05, %v625_v17 }
 0x4a8   :  { %2278 = vrsqrt.f32 %v627_v23  ;;  %vm635_vm2 = vweird.f32 %v627_v23 }
 0x4ab   :  { %v624_v22 = vpop.xlane.xlu2 %623 }
 0x4ac   :  { %v626_v39 = vmul.f32 0.015625, %v624_v22 }
 0x4ae   :  { %v2279_v40 = vpop.eup %2278  ;;  %v628_v29 = vadd.f32 1e-05, %v626_v39 }
 0x4af   :  { %v630_v27 = vmul.f32 %v2279_v40, %v627_v23  ;;  %vm636_vm1 = vweird.f32 %v2279_v40 }
 0x4b0   :  { %2280 = vrsqrt.f32 %v628_v29  ;;  %vm637_vm3 = vmor %vm635_vm2, %vm636_vm1  ;;  %vm645_vm5 = vweird.f32 %v628_v29 }
 0x4b1   :  { %v631_v35 = vmul.f32 %v2279_v40, %v630_v27 }
 0x4b3   :  { %v632_v48 = vmul.f32 0.5, %v631_v35 }
 0x4b5   :  { %v633_v33 = vsub.f32 1.5, %v632_v48 }
 0x4b6   :  { %v2281_v49 = vpop.eup %2280 }
 0x4b7   :  { %v634_v51 = vmul.f32 %v2279_v40, %v633_v33  ;;  %v640_v52 = vmul.f32 %v2281_v49, %v628_v29  ;;  %vm646_vm4 = vweird.f32 %v2281_v49  ;;  %v2188_v29 = vld [vmem:[#allocation10 + $0x10] sm:$0xff] }
 0x4b8   :  { %vm647_vm6 = vmor %vm645_vm5, %vm646_vm4 }
 0x4b9   :  { %v641_v53 = vmul.f32 %v2281_v49, %v640_v52  ;;  %v638_v56 = vsel %vm637_vm3, %v2279_v40, %v634_v51  ;;  %v2187_v52 = vld [vmem:[#allocation10 + $0x8] sm:$0xff] }
 0x4ba   :  { %v649_v4 = vmul.f32 %v638_v56, %v615_v31 }
 0x4bb   :  { %v642_v63 = vmul.f32 0.5, %v641_v53 }
 0x4bc   :  { %v654_v59 = vmul.f32 %v2257_v6, %v649_v4 }
 0x4bd   :  { %v643_v0 = vsub.f32 1.5, %v642_v63 }
 0x4be   :  { %v2783_v20 = vadd.f32 %v2258_v15, %v654_v59 }
 0x4bf   :  { %v644_v9 = vmul.f32 %v2281_v49, %v643_v0 }
 0x4c1   :  { %v648_v11 = vsel %vm647_vm6, %v2281_v49, %v644_v9 }
 0x4c2   :  { %v650_v54 = vmul.f32 %v648_v11, %v616_v3  ;;  %v2192_v3 = vld [vmem:[#allocation10 + $0x30] sm:$0xff]  ;;  %v2186_v11 = vld [vmem:[#allocation10] sm:$0xff] }
 0x4c3   :  { %894 = vmatpush.bf16.msra.mxu1 %v2192_v3 }
 0x4c4   :  { %v655_v16 = vmul.f32 %v2257_v6, %v650_v54 }
 0x4c6   :  { %v2785_v21 = vadd.f32 %v2258_v15, %v655_v16 }
 0x4c7   :  { %895 = vmatpush.bf16.msra.mxu1 %v2191_v8 }
 0x4c8   :  { %v661_v25 = vpack.c.bf16 %v2785_v21, %v2783_v20 }
 0x4ca   :  { %738 = vmatmul.bf16.vlgmr.msra.gmra.mxu0 %v661_v25 }
 0x4cb   :  { %896 = vmatpush.bf16.msra.mxu1 %v2190_v13 }
 0x4cf   :  { %897 = vmatpush.bf16.msra.mxu1 %v2189_v38 }
 0x4d3   :  { %898 = vmatpush.bf16.msra.mxu1 %v2188_v29 }
 0x4d7   :  { %899 = vmatpush.bf16.msra.mxu1 %v2187_v52 }
 0x4db   :  { %900 = vmatpush.bf16.msra.mxu1 %v2186_v11 }
 0x547   :  { %v739_v28 = vpop.f32.mrf.mxu0 }
 0x548   :  { %v2792_v31 = vadd.f32 %v2259_v26, %v739_v28 }
 0x54a   :  { %v2795_v32 = vmul.f32 0.70710677, %v2792_v31 }
 0x54c   :  { %v752_v61 = vand.u32 2147483647, %v2795_v32  ;;  %vm748_vm15 = vcmp.ge.f32.partialorder %v2795_v32, 0.0 }
 0x54e   :  { %v754_v44 = vmul.f32 0.3275911, %v752_v61  ;;  %v806_v56 = vsub.f32 0.0, %v752_v61 }
 0x54f   :  { %v741_v2 = vpop.f32.mrf.mxu0 }
 0x550   :  { %v756_v45 = vadd.f32 1.0, %v754_v44  ;;  %v2798_v34 = vadd.f32 %v2259_v26, %v741_v2  ;;  %v808_v59 = vmul.f32 %v806_v56, %v752_v61 }
 0x552   :  { %2282 = vrcp.f32 %v756_v45  ;;  %v2801_v7 = vmul.f32 0.70710677, %v2798_v34  ;;  %v769_v22 = vand.u32 2147483648, %v756_v45  ;;  %v767_v40 = vand.u32 2147483647, %v756_v45 }
 0x553   :  { %vm763_vm8 = vweird.f32 %v756_v45  ;;  %v810_v60 = vmul.f32 1.442695, %v808_v59  ;;  %v745_v32 = vmul.f32 0.5, %v2798_v34  ;;  %v2260_v59 = vld [vmem:[%s2970_s14] ss:$0 sm:$0xff] }
 0x554   :  { %v753_v36 = vand.u32 2147483647, %v2801_v7  ;;  %v770_v35 = vor.u32 1.1754944e-38, %v769_v22  ;;  %vm768_vm10 = vcmp.eq.f32.partialorder %v767_v40, 8.507059e+37  ;;  %vm749_vm0 = vcmp.ge.f32.partialorder %v2801_v7, 0.0 }
 0x556   :  { %v755_v12 = vmul.f32 0.3275911, %v753_v36  ;;  %v807_v3 = vsub.f32 0.0, %v753_v36 }
 0x558   :  { %v2283_v37 = vpop.eup %2282  ;;  %v757_v17 = vadd.f32 1.0, %v755_v12  ;;  %v809_v12 = vmul.f32 %v807_v3, %v753_v36 }
 0x559   :  { %v759_v18 = vmul.f32 %v2283_v37, %v756_v45  ;;  %vm764_vm7 = vweird.f32 %v2283_v37 }
 0x55a   :  { %2284 = vrcp.f32 %v757_v17  ;;  %vm765_vm9 = vmor %vm763_vm8, %vm764_vm7  ;;  %v784_v4 = vand.u32 2147483648, %v757_v17  ;;  %v782_v9 = vand.u32 2147483647, %v757_v17  ;;  %vm778_vm12 = vweird.f32 %v757_v17 }
 0x55b   :  { %v760_v23 = vsub.f32 1.0, %v759_v18  ;;  %2286 = vpow2.f32 %v810_v60  ;;  %v812_v38 = vmul.f32 1.442695, %v809_v12  ;;  %v2216_v12 = vld [vmem:[#allocation6 + $0x170] sm:$0xf0] }
 0x55c   :  { %v785_v25 = vor.u32 1.1754944e-38, %v784_v4  ;;  %vm783_vm14 = vcmp.eq.f32.partialorder %v782_v9, 8.507059e+37  ;;  %v744_v4 = vmul.f32 0.5, %v2792_v31 }
 0x55d   :  { %v761_v39 = vmul.f32 %v2283_v37, %v760_v23  ;;  %2288 = vpow2.f32 %v812_v38  ;;  %v2217_v38 = vld [vmem:[#allocation6 + $0x178] sm:$0xf0] }
 0x55f   :  { %v762_v27 = vadd.f32 %v2283_v37, %v761_v39 }
 0x560   :  { %v2285_v48 = vpop.eup %2284 }
 0x561   :  { %v766_v33 = vsel %vm765_vm9, %v2283_v37, %v762_v27  ;;  %v774_v51 = vmul.f32 %v2285_v48, %v757_v17  ;;  %vm779_vm11 = vweird.f32 %v2285_v48  ;;  %v2287_v22 = vpop.eup %2286 }
 0x562   :  { %v771_v49 = vsel %vm768_vm10, %v770_v35, %v766_v33  ;;  %vm780_vm13 = vmor %vm778_vm12, %vm779_vm11 }
 0x563   :  { %v788_v53 = vmul.f32 1.0614054, %v771_v49  ;;  %v775_v63 = vsub.f32 1.0, %v774_v51  ;;  %v2289_v33 = vpop.eup %2288  ;;  %v2501_v51 = vmov -1.0  }
 0x564   :  { %v750_v36 = vsel %vm748_vm15, 1.0, %v2501_v51  ;;  %v751_v56 = vsel %vm749_vm0, 1.0, %v2501_v51 }
 0x565   :  { %v790_v0 = vadd.f32 -1.4531521, %v788_v53  ;;  %v776_v6 = vmul.f32 %v2285_v48, %v775_v63 }
 0x567   :  { %v792_v54 = vmul.f32 %v790_v0, %v771_v49  ;;  %v777_v15 = vadd.f32 %v2285_v48, %v776_v6 }
 0x569   :  { %v794_v16 = vadd.f32 1.4214138, %v792_v54  ;;  %v781_v26 = vsel %vm780_vm13, %v2285_v48, %v777_v15 }
 0x56a   :  { %v786_v44 = vsel %vm783_vm14, %v785_v25, %v781_v26 }
 0x56b   :  { %v796_v28 = vmul.f32 %v794_v16, %v771_v49  ;;  %v789_v2 = vmul.f32 1.0614054, %v786_v44 }
 0x56d   :  { %v798_v45 = vadd.f32 -0.28449672, %v796_v28  ;;  %v791_v8 = vadd.f32 -1.4531521, %v789_v2 }
 0x56f   :  { %v800_v13 = vmul.f32 %v798_v45, %v771_v49  ;;  %v793_v37 = vmul.f32 %v791_v8, %v786_v44 }
 0x571   :  { %v802_v61 = vadd.f32 0.2548296, %v800_v13  ;;  %v795_v18 = vadd.f32 1.4214138, %v793_v37  ;;  %v2215_v37 = vld [vmem:[#allocation6 + $0x16c] sm:$0xf] }
 0x573   :  { %v804_v17 = vmul.f32 %v802_v61, %v771_v49  ;;  %v797_v23 = vmul.f32 %v795_v18, %v786_v44  ;;  %v2035_v18 = vld [vmem:[#allocation6 + $0x174] sm:$0xf0] }
 0x575   :  { %v814_v39 = vmul.f32 %v2287_v22, %v804_v17  ;;  %v799_v40 = vadd.f32 -0.28449672, %v797_v23  ;;  %v2041_v17 = vld [vmem:[#allocation6 + $0x170] sm:$0xf]  ;;  %v2038_v23 = vor.u32 %v2215_v37, %v2035_v18  ;;  %v2201_v37 = vld [vmem:[#allocation6 + $0xf8] sm:$0xf0] }
 0x576   :  { %v2042_v22 = vor.u32 %v2217_v38, %v2041_v17  ;;  %v1975_v17 = vld [vmem:[#allocation6 + $0xfc] sm:$0xf0]  ;;  %v1981_v38 = vld [vmem:[#allocation6 + $0xf8] sm:$0xf] }
 0x577   :  { %v801_v29 = vmul.f32 %v799_v40, %v786_v44  ;;  %v816_v27 = vsub.f32 1.0, %v814_v39  ;;  %1148 = vmatpush.bf16.msrb.mxu3 %v2038_v23  ;;  %v2021_v39 = vld [vmem:[#allocation6 + $0x150] sm:$0xf]  ;;  %v2213_v40 = vld [vmem:[#allocation6 + $0x158] sm:$0xf0] }
 0x578   :  { %1162 = vmatpush.bf16.msrb.mxu0 %v2042_v22  ;;  %v2202_v23 = vld [vmem:[#allocation6 + $0x100] sm:$0xf0] }
 0x579   :  { %v803_v35 = vadd.f32 0.2548296, %v801_v29  ;;  %v818_v52 = vmul.f32 %v816_v27, %v750_v36  ;;  %v2212_v29 = vld [vmem:[#allocation6 + $0x154] sm:$0xf]  ;;  %v2022_v27 = vor.u32 %v2213_v40, %v2021_v39  ;;  %v1982_v39 = vor.u32 %v2202_v23, %v1981_v38  ;;  %v1961_v40 = vld [vmem:[#allocation6 + $0xd8] sm:$0xf] }
 0x57b   :  { %v805_v48 = vmul.f32 %v803_v35, %v786_v44  ;;  %v820_v63 = vadd.f32 1.0, %v818_v52  ;;  %v2023_v35 = vld [vmem:[#allocation6 + $0x15c] sm:$0xf0] }
 0x57c   :  { %v2026_v36 = vor.u32 %v2212_v29, %v2023_v35  ;;  %v2198_v29 = vld [vmem:[#allocation6 + $0xe0] sm:$0xf0] }
 0x57d   :  { %v815_v49 = vmul.f32 %v2289_v33, %v805_v48  ;;  %v822_v9 = vmul.f32 %v820_v63, %v744_v4  ;;  %v2029_v48 = vld [vmem:[#allocation6 + $0x158] sm:$0xf]  ;;  %v2214_v33 = vld [vmem:[#allocation6 + $0x160] sm:$0xf0]  ;;  %v2017_v4 = vld [vmem:[#allocation6 + $0x140] sm:$0xf]  ;;  %v1962_v35 = vor.u32 %v2198_v29, %v1961_v40 }
 0x57e   :  { %v2030_v52 = vor.u32 %v2214_v33, %v2029_v48  ;;  %1149 = vmatpush.bf16.msrb.mxu3 %v2026_v36  ;;  %v1963_v48 = vld [vmem:[#allocation6 + $0xe4] sm:$0xf0]  ;;  %v1969_v33 = vld [vmem:[#allocation6 + $0xe0] sm:$0xf]  ;;  %v2199_v36 = vld [vmem:[#allocation6 + $0xe8] sm:$0xf0] }
 0x57f   :  { %v817_v53 = vsub.f32 1.0, %v815_v49  ;;  %v2009_v49 = vld [vmem:[#allocation6 + $0x138] sm:$0xf]  ;;  %v2320_v40 = vld [vmem:[#allocation2 + $0x68] sm:$0xff] }
 0x580   :  { %1163 = vmatpush.bf16.msrb.mxu0 %v2030_v52 }
 0x581   :  { %v819_v0 = vmul.f32 %v817_v53, %v751_v56  ;;  %v2210_v53 = vld [vmem:[#allocation6 + $0x140] sm:$0xf0]  ;;  %v2209_v56 = vld [vmem:[#allocation6 + $0x13c] sm:$0xf] }
 0x582   :  { %v2010_v63 = vor.u32 %v2210_v53, %v2009_v49  ;;  %v1970_v53 = vor.u32 %v2199_v36, %v1969_v33 }
 0x583   :  { %v821_v6 = vadd.f32 1.0, %v819_v0  ;;  %v2011_v0 = vld [vmem:[#allocation6 + $0x144] sm:$0xf0] }
 0x585   :  { %v823_v11 = vmul.f32 %v821_v6, %v745_v32  ;;  %v2211_v32 = vld [vmem:[#allocation6 + $0x148] sm:$0xf0]  ;;  %v2014_v6 = vor.u32 %v2209_v56, %v2011_v0  ;;  %v1949_v56 = vld [vmem:[#allocation6 + $0xc0] sm:$0xf]  ;;  %v2194_v0 = vld [vmem:[#allocation6 + $0xc4] sm:$0xf] }
 0x587   :  { %v824_v54 = vpack.c.bf16 %v823_v11, %v822_v9  ;;  %v2018_v9 = vor.u32 %v2211_v32, %v2017_v4  ;;  %1150 = vmatpush.bf16.msrb.mxu3 %v2014_v6  ;;  %v1997_v11 = vld [vmem:[#allocation6 + $0x120] sm:$0xf]  ;;  %v1951_v6 = vld [vmem:[#allocation6 + $0xcc] sm:$0xf0] }
 0x589   :  { %901 = vmatmul.bf16.vlgmr.msra.gmra.mxu1 %v824_v54  ;;  %1164 = vmatpush.bf16.msrb.mxu0 %v2018_v9  ;;  %v2207_v54 = vld [vmem:[#allocation6 + $0x128] sm:$0xf0]  ;;  %v1957_v9 = vld [vmem:[#allocation6 + $0xc8] sm:$0xf] }
 0x606   :  { %v902_v7 = vpop.f32.mrf.mxu1 }
 0x607   :  { %v903_v15 = vadd.f32 %v2260_v59, %v902_v7  ;;  %v1998_v7 = vor.u32 %v2207_v54, %v1997_v11  ;;  %v1954_v11 = vor.u32 %v2194_v0, %v1951_v6  ;;  %v2196_v54 = vld [vmem:[#allocation6 + $0xd0] sm:$0xf0] }
 0x609   :  { %v907_v16 = vadd.f32 %v903_v15, %v2783_v20  ;;  %v1999_v15 = vld [vmem:[#allocation6 + $0x12c] sm:$0xf0] }
 0x60b   :  { %911 = vadd.xlane.f32.xlu0 %v907_v16 }
 0x60e   :  { %v904_v25 = vpop.f32.mrf.mxu1 }
 0x60f   :  { %v905_v26 = vadd.f32 %v2260_v59, %v904_v25  ;;  %v2206_v59 = vld [vmem:[#allocation6 + $0x124] sm:$0xf]  ;;  %v2208_v25 = vld [vmem:[#allocation6 + $0x130] sm:$0xf0] }
 0x611   :  { %v908_v31 = vadd.f32 %v905_v26, %v2785_v21  ;;  %v2033_v21 = vld [vmem:[#allocation6 + $0x168] sm:$0xf]  ;;  %v2002_v26 = vor.u32 %v2206_v59, %v1999_v15 }
 0x612   :  { %v2034_v61 = vor.u32 %v2216_v12, %v2033_v21  ;;  %v1973_v12 = vld [vmem:[#allocation6 + $0xf0] sm:$0xf] }
 0x613   :  { %913 = vadd.xlane.f32.xlu1 %v908_v31  ;;  %1151 = vmatpush.bf16.msrb.mxu3 %v2002_v26  ;;  %v1974_v18 = vor.u32 %v2201_v37, %v1973_v12 }
 0x614   :  { %1134 = vmatpush.bf16.msra.mxu2 %v2034_v61  ;;  %v2200_v61 = vld [vmem:[#allocation6 + $0xf4] sm:$0xf] }
 0x615   :  { %v1978_v22 = vor.u32 %v2200_v61, %v1975_v17  ;;  %v2319_v17 = vld [vmem:[#allocation2 + $0x78] sm:$0xff] }
 0x618   :  { %1135 = vmatpush.bf16.msra.mxu2 %v2022_v27  ;;  %v2197_v27 = vld [vmem:[#allocation6 + $0xdc] sm:$0xf] }
 0x619   :  { %v1966_v49 = vor.u32 %v2197_v27, %v1963_v48 }
 0x61c   :  { %1136 = vmatpush.bf16.msra.mxu2 %v2010_v63  ;;  %v2195_v63 = vld [vmem:[#allocation6 + $0xc8] sm:$0xf0] }
 0x61d   :  { %v1950_v32 = vor.u32 %v2195_v63, %v1949_v56  ;;  %v2323_v63 = vld [vmem:[#allocation2 + $0x50] sm:$0xff] }
 0x620   :  { %1137 = vmatpush.bf16.msra.mxu2 %v1998_v7  ;;  %v1958_v7 = vor.u32 %v2196_v54, %v1957_v9 }
 0x67e   :  { %v912_v34 = vpop.xlane.xlu0 %911 }
 0x67f   :  { %v915_v28 = vmul.f32 0.015625, %v912_v34  ;;  %v1985_v34 = vld [vmem:[#allocation6 + $0x108] sm:$0xf] }
 0x681   :  { %v2815_v60 = vsub.f32 %v907_v16, %v915_v28  ;;  %v2005_v16 = vld [vmem:[#allocation6 + $0x128] sm:$0xf]  ;;  %v2204_v28 = vld [vmem:[#allocation6 + $0x110] sm:$0xf0] }
 0x683   :  { %v919_v44 = vmul.f32 %v2815_v60, %v2773_v55 }
 0x685   :  { %v921_v3 = vmul.f32 %v919_v44, %v919_v44  ;;  %v2203_v44 = vld [vmem:[#allocation6 + $0x10c] sm:$0xf] }
 0x686   :  { %v914_v2 = vpop.xlane.xlu1 %913 }
 0x687   :  { %v916_v45 = vmul.f32 0.015625, %v914_v2  ;;  %923 = vadd.xlane.f32.xlu2 %v921_v3  ;;  %v1986_v3 = vor.u32 %v2204_v28, %v1985_v34  ;;  %v1987_v2 = vld [vmem:[#allocation6 + $0x114] sm:$0xf0] }
 0x689   :  { %v2819_v8 = vsub.f32 %v908_v31, %v916_v45  ;;  %v2006_v31 = vor.u32 %v2208_v25, %v2005_v16  ;;  %v1993_v45 = vld [vmem:[#allocation6 + $0x110] sm:$0xf]  ;;  %1138 = vmatpush.bf16.msra.mxu2 %v1986_v3 }
 0x68b   :  { %v920_v20 = vmul.f32 %v2819_v8, %v2773_v55  ;;  %1165 = vmatpush.bf16.msrb.mxu0 %v2006_v31 }
 0x68d   :  { %v922_v13 = vmul.f32 %v920_v20, %v920_v20  ;;  %v2205_v20 = vld [vmem:[#allocation6 + $0x118] sm:$0xf0]  ;;  %1139 = vmatpush.bf16.msra.mxu2 %v1974_v18  ;;  %v2318_v18 = vld [vmem:[#allocation2 + $0x70] sm:$0xff] }
 0x68e   :  { %v1994_v21 = vor.u32 %v2205_v20, %v1993_v45 }
 0x68f   :  { %925 = vadd.xlane.f32.xlu0 %v922_v13  ;;  %v1990_v13 = vor.u32 %v2203_v44, %v1987_v2 }
 0x690   :  { %1166 = vmatpush.bf16.msrb.mxu0 %v1994_v21 }
 0x691   :  { %1152 = vmatpush.bf16.msrb.mxu3 %v1990_v13  ;;  %1140 = vmatpush.bf16.msra.mxu2 %v1962_v35  ;;  %v2321_v35 = vld [vmem:[#allocation2 + $0x60] sm:$0xff] }
 0x694   :  { %1167 = vmatpush.bf16.msrb.mxu0 %v1982_v39 }
 0x695   :  { %1153 = vmatpush.bf16.msrb.mxu3 %v1978_v22  ;;  %1141 = vmatpush.bf16.msra.mxu2 %v1950_v32  ;;  %v2324_v32 = vld [vmem:[#allocation2 + $0x48] sm:$0xff] }
 0x698   :  { %1168 = vmatpush.bf16.msrb.mxu0 %v1970_v53 }
 0x699   :  { %1154 = vmatpush.bf16.msrb.mxu3 %v1966_v49  ;;  %1251 = vmatpush.msrb.mxu2 %v2696_v57  ;;  %v2322_v49 = vld [vmem:[#allocation2 + $0x58] sm:$0xff] }
 0x69b   :  { %1252 = vmatpush.msrb.mxu2 %v2698_v58 }
 0x69c   :  { %1169 = vmatpush.bf16.msrb.mxu0 %v1958_v7 }
 0x69d   :  { %1155 = vmatpush.bf16.msrb.mxu3 %v1954_v11  ;;  %1253 = vmatpush.msrb.mxu2 %v2701_v62  ;;  %v2325_v11 = vld [vmem:[#allocation2 + $0x40] sm:$0xff] }
 0x69f   :  { %1254 = vmatpush.msrb.mxu2 %v2704_v1 }
 0x6a1   :  { %1255 = vmatpush.msrb.mxu2 %v2707_v5 }
 0x6a3   :  { %1256 = vmatpush.msrb.mxu2 %v2710_v10 }
 0x6a5   :  { %1257 = vmatpush.msrb.mxu2 %v2713_v14  ;;  %v2261_v14 = vld [vmem:[%s2971_s15] ss:$0 sm:$0xff] }
 0x6a7   :  { %1258 = vmatpush.msrb.mxu2 %v2716_v19 }
 0x6a9   :  { %1259 = vmatpush.msrb.mxu2 %v2722_v24 }
 0x6ab   :  { %1260 = vmatpush.msrb.mxu2 %v2725_v30  ;;  %v2262_v30 = vld [vmem:[%s2972_s16] ss:$0 sm:$0xff] }
 0x6ad   :  { %1261 = vmatpush.msrb.mxu2 %v2733_v41 }
 0x6af   :  { %1262 = vmatpush.msrb.mxu2 %v2736_v42 }
 0x6b1   :  { %1263 = vmatpush.msrb.mxu2 %v2739_v43  ;;  %v2856_v43 = vld [vmem:[%s2962_s6 + $0x3] sm:$0x7] }
 0x6b3   :  { %1264 = vmatpush.msrb.mxu2 %v2741_v46 }
 0x6b5   :  { %1265 = vmatpush.msrb.mxu2 %v2745_v47  ;;  %v1001_v47 = vperm.slane %v2856_v43, 1 }
 0x6b7   :  { %1266 = vmatpush.msrb.mxu2 %v2748_v50 }
 0x6fa   :  { %v924_v52 = vpop.xlane.xlu2 %923 }
 0x6fb   :  { %v927_v4 = vmul.f32 0.015625, %v924_v52 }
 0x6fd   :  { %v929_v59 = vadd.f32 1e-05, %v927_v4 }
 0x6ff   :  { %2290 = vrsqrt.f32 %v929_v59  ;;  %vm937_vm2 = vweird.f32 %v929_v59 }
 0x702   :  { %v926_v15 = vpop.xlane.xlu0 %925 }
 0x703   :  { %v928_v16 = vmul.f32 0.015625, %v926_v15  ;;  %v2326_v15 = vld [vmem:[#allocation2 + $0x38] sm:$0xff] }
 0x705   :  { %v2291_v25 = vpop.eup %2290  ;;  %v930_v26 = vadd.f32 1e-05, %v928_v16 }
 0x706   :  { %v932_v31 = vmul.f32 %v2291_v25, %v929_v59  ;;  %vm938_vm1 = vweird.f32 %v2291_v25 }
 0x707   :  { %2292 = vrsqrt.f32 %v930_v26  ;;  %vm939_vm3 = vmor %vm937_vm2, %vm938_vm1  ;;  %vm947_vm5 = vweird.f32 %v930_v26 }
 0x708   :  { %v933_v34 = vmul.f32 %v2291_v25, %v932_v31 }
 0x70a   :  { %v934_v28 = vmul.f32 0.5, %v933_v34 }
 0x70c   :  { %v935_v44 = vsub.f32 1.5, %v934_v28  ;;  %v2328_v28 = vld [vmem:[#allocation2 + $0x28] sm:$0xff] }
 0x70d   :  { %v2293_v57 = vpop.eup %2292 }
 0x70e   :  { %v936_v3 = vmul.f32 %v2291_v25, %v935_v44  ;;  %v942_v58 = vmul.f32 %v2293_v57, %v930_v26  ;;  %vm948_vm4 = vweird.f32 %v2293_v57  ;;  %v2327_v26 = vld [vmem:[#allocation2 + $0x30] sm:$0xff] }
 0x70f   :  { %vm949_vm6 = vmor %vm947_vm5, %vm948_vm4 }
 0x710   :  { %v943_v62 = vmul.f32 %v2293_v57, %v942_v58  ;;  %v940_v1 = vsel %vm939_vm3, %v2291_v25, %v936_v3  ;;  %v2329_v3 = vld [vmem:[#allocation2 + $0x20] sm:$0xff] }
 0x711   :  { %v951_v10 = vmul.f32 %v940_v1, %v2815_v60 }
 0x712   :  { %v944_v2 = vmul.f32 0.5, %v943_v62 }
 0x713   :  { %v956_v20 = vmul.f32 %v2261_v14, %v951_v10 }
 0x714   :  { %v945_v5 = vsub.f32 1.5, %v944_v2  ;;  %v2330_v2 = vld [vmem:[#allocation2 + $0x18] sm:$0xff] }
 0x715   :  { %v2845_v13 = vadd.f32 %v2262_v30, %v956_v20 }
 0x716   :  { %v946_v19 = vmul.f32 %v2293_v57, %v945_v5 }
 0x718   :  { %v950_v24 = vsel %vm949_vm6, %v2293_v57, %v946_v19 }
 0x719   :  { %v952_v45 = vmul.f32 %v950_v24, %v2819_v8  ;;  %v1002_v8 = vperm.slane %v2856_v43, 2 }
 0x71b   :  { %v957_v60 = vmul.f32 %v2261_v14, %v952_v45  ;;  %v2331_v14 = vld [vmem:[#allocation2 + $0x10] sm:$0xff]  ;;  %v2332_v45 = vld [vmem:[#allocation2 + $0x8] sm:$0xff] }
 0x71d   :  { %v2847_v41 = vadd.f32 %v2262_v30, %v957_v60  ;;  %v2333_v60 = vld [vmem:[#allocation2] sm:$0xff] }
 0x71f   :  { %v963_v42 = vpack.c.bf16 %v2847_v41, %v2845_v13 }
 0x721   :  { %1142 = vmatmul.bf16.vlgmr.msra.gmra.mxu2 %v963_v42  ;;  %1156 = vmatmul.bf16.vlgmr.msrb.gmra.mxu3 %v963_v42 }
 0x722   :  { %1170 = vmatmul.bf16.vlgmr.msrb.gmra.mxu0 %v963_v42 }
 0x79f   :  { %v1171_v46 = vpop.f32.mrf.mxu0 }
 0x7a0   :  { %v2859_v12 = vadd.f32 %v1171_v46, %v1002_v8 }
 0x7a2   :  { %v1216_v50 = vmul.f32 %v2318_v18, %v2859_v12  ;;  %v1214_v48 = vmul.f32 %v2321_v35, %v2859_v12  ;;  %v1212_v0 = vmul.f32 %v2323_v63, %v2859_v12  ;;  %v1210_v54 = vmul.f32 %v2325_v11, %v2859_v12 }
 0x7a3   :  { %v1208_v31 = vmul.f32 %v2327_v26, %v2859_v12  ;;  %v1206_v58 = vmul.f32 %v2329_v3, %v2859_v12  ;;  %v1204_v19 = vmul.f32 %v2331_v14, %v2859_v12  ;;  %v1202_v42 = vmul.f32 %v2333_v60, %v2859_v12 }
 0x7a4   :  { %v1157_v21 = vpop.f32.mrf.mxu3 }
 0x7a5   :  { %v2863_v23 = vadd.f32 %v1157_v21, %v1001_v47 }
 0x7a7   :  { %v1173_v37 = vpop.f32.mrf.mxu0  ;;  %v1192_v33 = vmul.f32 %v2318_v18, %v2863_v23  ;;  %v1190_v59 = vmul.f32 %v2321_v35, %v2863_v23  ;;  %v1188_v62 = vmul.f32 %v2323_v63, %v2863_v23  ;;  %v1186_v46 = vmul.f32 %v2325_v11, %v2863_v23 }
 0x7a8   :  { %v1174_v61 = vadd.f32 %v1173_v37, %v1002_v8  ;;  %v1184_v37 = vmul.f32 %v2327_v26, %v2863_v23  ;;  %v1000_v35 = vperm.slane %v2856_v43, 0  ;;  %v2335_v43 = vld [vmem:[%s2958_s2 + $0x8] sm:$0xff] }
 0x7a9   :  { %v2223_v26 = vld [vmem:[#allocation7 + $0x68] sm:$0xff] }
 0x7aa   :  { %v1217_v38 = vmul.f32 %v2319_v17, %v1174_v61  ;;  %v1215_v29 = vmul.f32 %v2320_v40, %v1174_v61  ;;  %v1213_v53 = vmul.f32 %v2322_v49, %v1174_v61  ;;  %v1211_v6 = vmul.f32 %v2324_v32, %v1174_v61 }
 0x7ab   :  { %v1209_v16 = vmul.f32 %v2326_v15, %v1174_v61  ;;  %v1207_v44 = vmul.f32 %v2328_v28, %v1174_v61  ;;  %v1205_v5 = vmul.f32 %v2330_v2, %v1174_v61  ;;  %v1203_v20 = vmul.f32 %v2332_v45, %v1174_v61 }
 0x7ac   :  { %v1159_v22 = vpop.f32.mrf.mxu3  ;;  %v1225_v39 = vpack.c.bf16 %v1217_v38, %v1216_v50  ;;  %v1224_v52 = vpack.c.bf16 %v1215_v29, %v1214_v48  ;;  %v1223_v4 = vpack.c.bf16 %v1213_v53, %v1212_v0  ;;  %v1222_v7 = vpack.c.bf16 %v1211_v6, %v1210_v54  ;;  %v1143_v38 = vpop.f32.mrf.mxu2  ;;  %v2334_v0 = vld [vmem:[%s2958_s2] sm:$0xff] }
 0x7ad   :  { %v2865_v27 = vadd.f32 %v1159_v22, %v1001_v47  ;;  %v1221_v34 = vpack.c.bf16 %v1209_v16, %v1208_v31  ;;  %v1220_v1 = vpack.c.bf16 %v1207_v44, %v1206_v58  ;;  %v1219_v24 = vpack.c.bf16 %v1205_v5, %v1204_v19  ;;  %v2225_v16 = vld [vmem:[#allocation7 + $0x78] sm:$0xff]  ;;  %v2222_v31 = vld [vmem:[#allocation7 + $0x60] sm:$0xff]  ;;  %v2219_v5 = vld [vmem:[#allocation7 + $0x48] sm:$0xff] }
 0x7ae   :  { %1279 = vmatpush.bf16.msra.mxu3 %v1225_v39  ;;  %v1218_v8 = vpack.c.bf16 %v1203_v20, %v1202_v42  ;;  %v1182_v50 = vmul.f32 %v2329_v3, %v2863_v23  ;;  %v1180_v22 = vmul.f32 %v2331_v14, %v2863_v23  ;;  %v1178_v48 = vmul.f32 %v2333_v60, %v2863_v23 }
 0x7af   :  { %v1193_v36 = vmul.f32 %v2319_v17, %v2865_v27  ;;  %v1191_v9 = vmul.f32 %v2320_v40, %v2865_v27  ;;  %v1189_v57 = vmul.f32 %v2322_v49, %v2865_v27  ;;  %v1187_v30 = vmul.f32 %v2324_v32, %v2865_v27  ;;  %1364 = vmatpush.bf16.msra.mxu0 %v2225_v16  ;;  %v2264_v16 = vld [vmem:[%s2965_s9 + $0x1] ss:$0 sm:$0xff] }
 0x7b0   :  { %v1185_v47 = vmul.f32 %v2326_v15, %v2865_v27  ;;  %v1183_v61 = vmul.f32 %v2328_v28, %v2865_v27  ;;  %v1181_v12 = vmul.f32 %v2330_v2, %v2865_v27  ;;  %v1179_v29 = vmul.f32 %v2332_v45, %v2865_v27  ;;  %v2221_v28 = vld [vmem:[#allocation7 + $0x58] sm:$0xff]  ;;  %v2220_v2 = vld [vmem:[#allocation7 + $0x50] sm:$0xff]  ;;  %v2263_v45 = vld [vmem:[%s2964_s8 + $0x1] ss:$0 sm:$0xff] }
 0x7b1   :  { %v1201_v56 = vpack.c.bf16 %v1193_v36, %v1192_v33  ;;  %v1200_v25 = vpack.c.bf16 %v1191_v9, %v1190_v59  ;;  %v1199_v10 = vpack.c.bf16 %v1189_v57, %v1188_v62  ;;  %v1198_v21 = vpack.c.bf16 %v1187_v30, %v1186_v46 }
 0x7b2   :  { %1280 = vmatpush.bf16.msra.mxu3 %v1224_v52  ;;  %v1197_v18 = vpack.c.bf16 %v1185_v47, %v1184_v37  ;;  %v1196_v17 = vpack.c.bf16 %v1183_v61, %v1182_v50  ;;  %v1195_v39 = vpack.c.bf16 %v1181_v12, %v1180_v22  ;;  %v1194_v36 = vpack.c.bf16 %v1179_v29, %v1178_v48  ;;  %v2229_v29 = vld [vmem:[#allocation9 + $0x58] sm:$0xff] }
 0x7b3   :  { %1227 = vmatpush.bf16.xpose.msrb.mxu1 %v1201_v56  ;;  %v1144_v52 = vadd.f32 %v1143_v38, %v1000_v35 }
 0x7b4   :  { %v1145_v40 = vpop.f32.mrf.mxu2 }
 0x7b5   :  { %v1146_v33 = vadd.f32 %v1145_v40, %v1000_v35  ;;  %v1176_v53 = vmul.f32 0.35355338, %v1144_v52  ;;  %v2230_v40 = vld [vmem:[#allocation9 + $0x60] sm:$0xff]  ;;  %v2228_v35 = vld [vmem:[#allocation9 + $0x50] sm:$0xff] }
 0x7b6   :  { %1281 = vmatpush.bf16.msra.mxu3 %v1223_v4 }
 0x7b7   :  { %v1177_v49 = vmul.f32 0.35355338, %v1146_v33  ;;  %v2227_v33 = vld [vmem:[#allocation9 + $0x48] sm:$0xff] }
 0x7b9   :  { %v1226_v56 = vpack.c.bf16 %v1177_v49, %v1176_v53  ;;  %v2226_v49 = vld [vmem:[#allocation9 + $0x40] sm:$0xff] }
 0x7ba   :  { %1282 = vmatpush.bf16.msra.mxu3 %v1222_v7 }
 0x7bb   :  { %1228 = vmatpush.bf16.xpose.msrb.mxu1 %v1200_v25  ;;  %v2224_v25 = vld [vmem:[#allocation7 + $0x70] sm:$0xff] }
 0x7bc   :  { %1365 = vmatpush.bf16.msra.mxu0 %v2224_v25 }
 0x7be   :  { %1283 = vmatpush.bf16.msra.mxu3 %v1221_v34 }
 0x7c0   :  { %1366 = vmatpush.bf16.msra.mxu0 %v2223_v26 }
 0x7c2   :  { %1284 = vmatpush.bf16.msra.mxu3 %v1220_v1 }
 0x7c3   :  { %1229 = vmatpush.bf16.xpose.msrb.mxu1 %v1199_v10  ;;  %v2218_v10 = vld [vmem:[#allocation7 + $0x40] sm:$0xff] }
 0x7c4   :  { %1367 = vmatpush.bf16.msra.mxu0 %v2222_v31 }
 0x7c6   :  { %1285 = vmatpush.bf16.msra.mxu3 %v1219_v24 }
 0x7c8   :  { %1368 = vmatpush.bf16.msra.mxu0 %v2221_v28  ;;  %v2265_v28 = vld [vmem:[%s2966_s10 + $0x1] ss:$0 sm:$0xff] }
 0x7ca   :  { %1286 = vmatpush.bf16.msra.mxu3 %v1218_v8 }
 0x7cb   :  { %1230 = vmatpush.bf16.xpose.msrb.mxu1 %v1198_v21 }
 0x7cc   :  { %1369 = vmatpush.bf16.msra.mxu0 %v2220_v2 }
 0x7d0   :  { %1370 = vmatpush.bf16.msra.mxu0 %v2219_v5 }
 0x7d3   :  { %1231 = vmatpush.bf16.xpose.msrb.mxu1 %v1197_v18 }
 0x7d4   :  { %1371 = vmatpush.bf16.msra.mxu0 %v2218_v10 }
 0x7db   :  { %1232 = vmatpush.bf16.xpose.msrb.mxu1 %v1196_v17 }
 0x7e3   :  { %1233 = vmatpush.bf16.xpose.msrb.mxu1 %v1195_v39  ;;  %v2232_v39 = vld [vmem:[#allocation9 + $0x70] sm:$0xff] }
 0x7eb   :  { %1234 = vmatpush.bf16.xpose.msrb.mxu1 %v1194_v36 }
 0x7f2   :  { %1235 = vmatmul.bf16.vlgmr.msrb.gmra.mxu1 %v1226_v56 }
 0x86f   :  { %v1236_v63 = vpop.f32.mrf.mxu1 }
 0x870   :  { %v1237_v4 = vadd.f32 %v2334_v0, %v1236_v63 }
 0x872   :  { %1241 = vmax.xlane.f32.xlu1 %v1237_v4 }
 0x877   :  { %v1238_v27 = vpop.f32.mrf.mxu1 }
 0x878   :  { %v1239_v23 = vadd.f32 %v2335_v43, %v1238_v27 }
 0x87a   :  { %1243 = vmax.xlane.f32.xlu2 %v1239_v23 }
 0x8e5   :  { %v1242_v32 = vpop.xlane.xlu1 %1241 }
 0x8e6   :  { %v1245_v6 = vsub.f32 %v1237_v4, %v1242_v32 }
 0x8e8   :  { %v1247_v9 = vmul.f32 1.442695, %v1245_v6 }
 0x8ea   :  { %2294 = vpow2.f32 %v1247_v9 }
 0x8ed   :  { %v1244_v11 = vpop.xlane.xlu2 %1243 }
 0x8ee   :  { %v1246_v54 = vsub.f32 %v1239_v23, %v1244_v11 }
 0x8f0   :  { %v2295_v59 = vpop.eup %2294  ;;  %v1249_v7 = vmul.f32 1.442695, %v1246_v54 }
 0x8f1   :  { %1267 = vmatmul.f32.vlgmr.msrb.gmra.mxu2 %v2295_v59 }
 0x8f2   :  { %2296 = vpow2.f32 %v1249_v7 }
 0x8f8   :  { %v2297_v15 = vpop.eup %2296 }
 0x8f9   :  { %1270 = vmatmul.f32.gmra.mxu2 %v2297_v15 }
 0x974   :  { %v1268_v34 = vpop.f32.mrf.mxu2 }
 0x975   :  { %2298 = vrcp.f32 %v1268_v34 }
 0x97b   :  { %v2299_v57 = vpop.eup %2298 }
 0x97c   :  { %v1271_v44 = vpop.f32.mrf.mxu2  ;;  %v1276_v58 = vmul.f32 %v2299_v57, %v2295_v59 }
 0x97d   :  { %2300 = vrcp.f32 %v1271_v44 }
 0x983   :  { %v2301_v3 = vpop.eup %2300 }
 0x984   :  { %v1277_v62 = vmul.f32 %v2301_v3, %v2297_v15 }
 0x986   :  { %v1278_v1 = vpack.c.bf16 %v1277_v62, %v1276_v58  ;;  %v2266_v62 = vld [vmem:[%s2968_s12 + $0x1] ss:$0 sm:$0xff] }
 0x988   :  { %1287 = vmatmul.bf16.vlgmr.msra.gmra.mxu3 %v1278_v1 }
 0xa0b   :  { %v1288_v14 = vpop.f32.mrf.mxu3 }
 0xa13   :  { %v1290_v19 = vpop.f32.mrf.mxu3 }
 0xa14   :  { %v1293_v24 = vpack.c.bf16 %v1290_v19, %v1288_v14  ;;  %v2241_v14 = vld [vmem:[#allocation10 + $0x78] sm:$0xff] }
 0xa15   :  { %1672 = vmatpush.bf16.msrb.mxu3 %v2241_v14 }
 0xa16   :  { %1372 = vmatmul.bf16.vlgmr.msra.gmra.mxu0 %v1293_v24 }
 0xa93   :  { %v1373_v20 = vpop.f32.mrf.mxu0 }
 0xa94   :  { %v1374_v30 = vadd.f32 %v2263_v45, %v1373_v20 }
 0xa96   :  { %v1378_v60 = vadd.f32 %v1374_v30, %v2845_v13  ;;  %v2233_v13 = vld [vmem:[#allocation9 + $0x78] sm:$0xff]  ;;  %v2240_v30 = vld [vmem:[#allocation10 + $0x70] sm:$0xff] }
 0xa97   :  { %1507 = vmatpush.bf16.msra.mxu2 %v2233_v13  ;;  %1673 = vmatpush.bf16.msrb.mxu3 %v2240_v30 }
 0xa98   :  { %1384 = vadd.xlane.f32.xlu0 %v1378_v60 }
 0xa9b   :  { %v1375_v42 = vpop.f32.mrf.mxu0  ;;  %1508 = vmatpush.bf16.msra.mxu2 %v2232_v39  ;;  %v2236_v39 = vld [vmem:[#allocation10 + $0x50] sm:$0xff] }
 0xa9c   :  { %v1376_v46 = vadd.f32 %v2263_v45, %v1375_v42  ;;  %v2239_v42 = vld [vmem:[#allocation10 + $0x68] sm:$0xff] }
 0xa9d   :  { %1674 = vmatpush.bf16.msrb.mxu3 %v2239_v42 }
 0xa9e   :  { %v1379_v8 = vadd.f32 %v1376_v46, %v2847_v41  ;;  %v2231_v41 = vld [vmem:[#allocation9 + $0x68] sm:$0xff] }
 0xa9f   :  { %1509 = vmatpush.bf16.msra.mxu2 %v2231_v41 }
 0xaa0   :  { %1386 = vadd.xlane.f32.xlu1 %v1379_v8 }
 0xaa3   :  { %1510 = vmatpush.bf16.msra.mxu2 %v2230_v40 }
 0xaa7   :  { %1511 = vmatpush.bf16.msra.mxu2 %v2229_v29 }
 0xaab   :  { %1512 = vmatpush.bf16.msra.mxu2 %v2228_v35 }
 0xaaf   :  { %1513 = vmatpush.bf16.msra.mxu2 %v2227_v33 }
 0xab3   :  { %1514 = vmatpush.bf16.msra.mxu2 %v2226_v49 }
 0xb0b   :  { %v1385_v21 = vpop.xlane.xlu0 %1384 }
 0xb0c   :  { %v1388_v47 = vmul.f32 0.015625, %v1385_v21 }
 0xb0e   :  { %v1390_v37 = vsub.f32 %v1378_v60, %v1388_v47  ;;  %v2238_v47 = vld [vmem:[#allocation10 + $0x60] sm:$0xff] }
 0xb0f   :  { %1675 = vmatpush.bf16.msrb.mxu3 %v2238_v47 }
 0xb10   :  { %v1392_v18 = vmul.f32 %v1390_v37, %v2773_v55 }
 0xb12   :  { %v1394_v61 = vmul.f32 %v1392_v18, %v1392_v18 }
 0xb13   :  { %v1387_v50 = vpop.xlane.xlu1 %1386 }
 0xb14   :  { %v1389_v17 = vmul.f32 0.015625, %v1387_v50  ;;  %1396 = vadd.xlane.f32.xlu2 %v1394_v61 }
 0xb16   :  { %v1391_v38 = vsub.f32 %v1379_v8, %v1389_v17  ;;  %v2237_v17 = vld [vmem:[#allocation10 + $0x58] sm:$0xff] }
 0xb17   :  { %1676 = vmatpush.bf16.msrb.mxu3 %v2237_v17 }
 0xb18   :  { %v1393_v12 = vmul.f32 %v1391_v38, %v2773_v55 }
 0xb1a   :  { %v1395_v22 = vmul.f32 %v1393_v12, %v1393_v12 }
 0xb1b   :  { %1677 = vmatpush.bf16.msrb.mxu3 %v2236_v39 }
 0xb1c   :  { %1398 = vadd.xlane.f32.xlu0 %v1395_v22 }
 0xb87   :  { %v1397_v48 = vpop.xlane.xlu2 %1396 }
 0xb88   :  { %v1400_v36 = vmul.f32 0.015625, %v1397_v48 }
 0xb8a   :  { %v1402_v52 = vadd.f32 1e-05, %v1400_v36 }
 0xb8c   :  { %2302 = vrsqrt.f32 %v1402_v52  ;;  %vm1410_vm8 = vweird.f32 %v1402_v52 }
 0xb8f   :  { %v1399_v53 = vpop.xlane.xlu0 %1398 }
 0xb90   :  { %v1401_v56 = vmul.f32 0.015625, %v1399_v53 }
 0xb92   :  { %v2303_v63 = vpop.eup %2302  ;;  %v1403_v0 = vadd.f32 1e-05, %v1401_v56 }
 0xb93   :  { %v1405_v4 = vmul.f32 %v2303_v63, %v1402_v52  ;;  %vm1411_vm7 = vweird.f32 %v2303_v63  ;;  %v2235_v52 = vld [vmem:[#allocation10 + $0x48] sm:$0xff] }
 0xb94   :  { %2304 = vrsqrt.f32 %v1403_v0  ;;  %vm1412_vm9 = vmor %vm1410_vm8, %vm1411_vm7  ;;  %vm1420_vm11 = vweird.f32 %v1403_v0  ;;  %1678 = vmatpush.bf16.msrb.mxu3 %v2235_v52 }
 0xb95   :  { %v1406_v27 = vmul.f32 %v2303_v63, %v1405_v4 }
 0xb97   :  { %v1407_v43 = vmul.f32 0.5, %v1406_v27 }
 0xb99   :  { %v1408_v23 = vsub.f32 1.5, %v1407_v43  ;;  %v2234_v43 = vld [vmem:[#allocation10 + $0x40] sm:$0xff] }
 0xb9a   :  { %v2305_v32 = vpop.eup %2304  ;;  %1679 = vmatpush.bf16.msrb.mxu3 %v2234_v43 }
 0xb9b   :  { %v1409_v6 = vmul.f32 %v2303_v63, %v1408_v23  ;;  %v1415_v9 = vmul.f32 %v2305_v32, %v1403_v0  ;;  %vm1421_vm10 = vweird.f32 %v2305_v32 }
 0xb9c   :  { %vm1422_vm12 = vmor %vm1420_vm11, %vm1421_vm10 }
 0xb9d   :  { %v1416_v11 = vmul.f32 %v2305_v32, %v1415_v9  ;;  %v1413_v54 = vsel %vm1412_vm9, %v2303_v63, %v1409_v6 }
 0xb9e   :  { %v1424_v15 = vmul.f32 %v1413_v54, %v1390_v37 }
 0xb9f   :  { %v1417_v59 = vmul.f32 0.5, %v1416_v11 }
 0xba0   :  { %v1429_v34 = vmul.f32 %v2264_v16, %v1424_v15 }
 0xba1   :  { %v1418_v7 = vsub.f32 1.5, %v1417_v59 }
 0xba2   :  { %v2910_v57 = vadd.f32 %v2265_v28, %v1429_v34 }
 0xba3   :  { %v1419_v25 = vmul.f32 %v2305_v32, %v1418_v7 }
 0xba5   :  { %v1423_v26 = vsel %vm1422_vm12, %v2305_v32, %v1419_v25 }
 0xba6   :  { %v1425_v31 = vmul.f32 %v1423_v26, %v1391_v38 }
 0xba8   :  { %v1430_v44 = vmul.f32 %v2264_v16, %v1425_v31 }
 0xbaa   :  { %v2912_v3 = vadd.f32 %v2265_v28, %v1430_v44 }
 0xbac   :  { %v1436_v58 = vpack.c.bf16 %v2912_v3, %v2910_v57 }
 0xbae   :  { %1515 = vmatmul.bf16.vlgmr.msra.gmra.mxu2 %v1436_v58 }
 0xc31   :  { %v1516_v1 = vpop.f32.mrf.mxu2 }
 0xc32   :  { %v2919_v2 = vadd.f32 %v2266_v62, %v1516_v1 }
 0xc34   :  { %v2922_v5 = vmul.f32 0.70710677, %v2919_v2 }
 0xc36   :  { %v1529_v10 = vand.u32 2147483647, %v2922_v5  ;;  %vm1525_vm5 = vcmp.ge.f32.partialorder %v2922_v5, 0.0 }
 0xc38   :  { %v1531_v19 = vmul.f32 0.3275911, %v1529_v10  ;;  %v1583_v33 = vsub.f32 0.0, %v1529_v10 }
 0xc39   :  { %v1518_v24 = vpop.f32.mrf.mxu2 }
 0xc3a   :  { %v1533_v45 = vadd.f32 1.0, %v1531_v19  ;;  %v2925_v20 = vadd.f32 %v2266_v62, %v1518_v24  ;;  %v1585_v4 = vmul.f32 %v1583_v33, %v1529_v10 }
 0xc3c   :  { %2306 = vrcp.f32 %v1533_v45  ;;  %v2928_v60 = vmul.f32 0.70710677, %v2925_v20  ;;  %v1546_v50 = vand.u32 2147483648, %v1533_v45  ;;  %v1544_v12 = vand.u32 2147483647, %v1533_v45 }
 0xc3d   :  { %vm1540_vm14 = vweird.f32 %v1533_v45  ;;  %v1587_v11 = vmul.f32 1.442695, %v1585_v4  ;;  %v1522_v17 = vmul.f32 0.5, %v2925_v20 }
 0xc3e   :  { %v1530_v46 = vand.u32 2147483647, %v2928_v60  ;;  %v1547_v13 = vor.u32 1.1754944e-38, %v1546_v50  ;;  %vm1545_vm0 = vcmp.eq.f32.partialorder %v1544_v12, 8.507059e+37  ;;  %vm1526_vm6 = vcmp.ge.f32.partialorder %v2928_v60, 0.0 }
 0xc3f   :  { %v1521_v50 = vmul.f32 0.5, %v2919_v2 }
 0xc40   :  { %v1532_v8 = vmul.f32 0.3275911, %v1530_v46  ;;  %v1584_v59 = vsub.f32 0.0, %v1530_v46 }
 0xc42   :  { %v2307_v21 = vpop.eup %2306  ;;  %v1534_v18 = vadd.f32 1.0, %v1532_v8  ;;  %v1586_v26 = vmul.f32 %v1584_v59, %v1530_v46  ;;  %v1527_v8 = vsel %vm1525_vm5, 1.0, %v2501_v51  ;;  %v2268_v59 = vld [vmem:[%s2971_s15 + $0x1] ss:$0 sm:$0xff] }
 0xc43   :  { %v1536_v37 = vmul.f32 %v2307_v21, %v1533_v45  ;;  %vm1541_vm13 = vweird.f32 %v2307_v21 }
 0xc44   :  { %2308 = vrcp.f32 %v1534_v18  ;;  %vm1542_vm15 = vmor %vm1540_vm14, %vm1541_vm13  ;;  %v1561_v53 = vand.u32 2147483648, %v1534_v18  ;;  %v1559_v63 = vand.u32 2147483647, %v1534_v18  ;;  %vm1555_vm2 = vweird.f32 %v1534_v18 }
 0xc45   :  { %v1537_v61 = vsub.f32 1.0, %v1536_v37  ;;  %2310 = vpow2.f32 %v1587_v11  ;;  %v1589_v58 = vmul.f32 1.442695, %v1586_v26  ;;  %v1528_v37 = vsel %vm1526_vm6, 1.0, %v2501_v51 }
 0xc46   :  { %v1562_v32 = vor.u32 1.1754944e-38, %v1561_v53  ;;  %vm1560_vm4 = vcmp.eq.f32.partialorder %v1559_v63, 8.507059e+37 }
 0xc47   :  { %v1538_v38 = vmul.f32 %v2307_v21, %v1537_v61  ;;  %2312 = vpow2.f32 %v1589_v58 }
 0xc49   :  { %v1539_v22 = vadd.f32 %v2307_v21, %v1538_v38 }
 0xc4a   :  { %v2309_v41 = vpop.eup %2308 }
 0xc4b   :  { %v1543_v40 = vsel %vm1542_vm15, %v2307_v21, %v1539_v22  ;;  %v1551_v35 = vmul.f32 %v2309_v41, %v1534_v18  ;;  %vm1556_vm1 = vweird.f32 %v2309_v41  ;;  %v2311_v1 = vpop.eup %2310 }
 0xc4c   :  { %v1548_v29 = vsel %vm1545_vm0, %v1547_v13, %v1543_v40  ;;  %vm1557_vm3 = vmor %vm1555_vm2, %vm1556_vm1  ;;  %v2267_v13 = vld [vmem:[%s2970_s14 + $0x1] ss:$0 sm:$0xff] }
 0xc4d   :  { %v1565_v48 = vmul.f32 1.0614054, %v1548_v29  ;;  %v1552_v36 = vsub.f32 1.0, %v1551_v35  ;;  %v2313_v42 = vpop.eup %2312 }
 0xc4f   :  { %v1567_v49 = vadd.f32 -1.4531521, %v1565_v48  ;;  %v1553_v56 = vmul.f32 %v2309_v41, %v1552_v36 }
 0xc51   :  { %v1569_v0 = vmul.f32 %v1567_v49, %v1548_v29  ;;  %v1554_v27 = vadd.f32 %v2309_v41, %v1553_v56 }
 0xc53   :  { %v1571_v23 = vadd.f32 1.4214138, %v1569_v0  ;;  %v1558_v6 = vsel %vm1557_vm3, %v2309_v41, %v1554_v27 }
 0xc54   :  { %v1563_v54 = vsel %vm1560_vm4, %v1562_v32, %v1558_v6 }
 0xc55   :  { %v1573_v9 = vmul.f32 %v1571_v23, %v1548_v29  ;;  %v1566_v7 = vmul.f32 1.0614054, %v1563_v54 }
 0xc57   :  { %v1575_v15 = vadd.f32 -0.28449672, %v1573_v9  ;;  %v1568_v16 = vadd.f32 -1.4531521, %v1566_v7 }
 0xc59   :  { %v1577_v25 = vmul.f32 %v1575_v15, %v1548_v29  ;;  %v1570_v31 = vmul.f32 %v1568_v16, %v1563_v54  ;;  %v2269_v16 = vld [vmem:[%s2972_s16 + $0x1] ss:$0 sm:$0xff] }
 0xc5b   :  { %v1579_v34 = vadd.f32 0.2548296, %v1577_v25  ;;  %v1572_v28 = vadd.f32 1.4214138, %v1570_v31 }
 0xc5d   :  { %v1581_v44 = vmul.f32 %v1579_v34, %v1548_v29  ;;  %v1574_v62 = vmul.f32 %v1572_v28, %v1563_v54 }
 0xc5f   :  { %v1591_v10 = vmul.f32 %v2311_v1, %v1581_v44  ;;  %v1576_v14 = vadd.f32 -0.28449672, %v1574_v62 }
 0xc61   :  { %v1578_v19 = vmul.f32 %v1576_v14, %v1563_v54  ;;  %v1593_v24 = vsub.f32 1.0, %v1591_v10 }
 0xc63   :  { %v1580_v45 = vadd.f32 0.2548296, %v1578_v19  ;;  %v1595_v46 = vmul.f32 %v1593_v24, %v1527_v8 }
 0xc65   :  { %v1582_v30 = vmul.f32 %v1580_v45, %v1563_v54  ;;  %v1597_v18 = vadd.f32 1.0, %v1595_v46 }
 0xc67   :  { %v1592_v21 = vmul.f32 %v2313_v42, %v1582_v30  ;;  %v1599_v38 = vmul.f32 %v1597_v18, %v1521_v50 }
 0xc69   :  { %v1594_v47 = vsub.f32 1.0, %v1592_v21 }
 0xc6b   :  { %v1596_v61 = vmul.f32 %v1594_v47, %v1528_v37 }
 0xc6d   :  { %v1598_v5 = vadd.f32 1.0, %v1596_v61 }
 0xc6f   :  { %v1600_v12 = vmul.f32 %v1598_v5, %v1522_v17 }
 0xc71   :  { %v1601_v22 = vpack.c.bf16 %v1600_v12, %v1599_v38 }
 0xc73   :  { %1680 = vmatmul.bf16.vlgmr.msrb.gmra.mxu3 %v1601_v22 }
 0xcf6   :  { %v1681_v60 = vpop.f32.mrf.mxu3 }
 0xcf7   :  { %v1682_v39 = vadd.f32 %v2267_v13, %v1681_v60 }
 0xcf9   :  { %v1686_v41 = vadd.f32 %v1682_v39, %v2910_v57 }
 0xcfb   :  { %1692 = vadd.xlane.f32.xlu1 %v1686_v41 }
 0xcfe   :  { %v1683_v51 = vpop.f32.mrf.mxu3 }
 0xcff   :  { %v1684_v40 = vadd.f32 %v2267_v13, %v1683_v51 }
 0xd01   :  { %v1687_v2 = vadd.f32 %v1684_v40, %v2912_v3 }
 0xd03   :  { %1694 = vadd.xlane.f32.xlu2 %v1687_v2 }
 0xd6e   :  { %v1693_v20 = vpop.xlane.xlu1 %1692 }
 0xd6f   :  { %v1696_v29 = vmul.f32 0.015625, %v1693_v20 }
 0xd71   :  { %v1698_v35 = vsub.f32 %v1686_v41, %v1696_v29 }
 0xd73   :  { %v1700_v48 = vmul.f32 %v1698_v35, %v2773_v55 }
 0xd75   :  { %v1702_v33 = vmul.f32 %v1700_v48, %v1700_v48 }
 0xd76   :  { %v1695_v36 = vpop.xlane.xlu2 %1694 }
 0xd77   :  { %v1697_v52 = vmul.f32 0.015625, %v1695_v36  ;;  %1704 = vadd.xlane.f32.xlu0 %v1702_v33 }
 0xd79   :  { %v1699_v49 = vsub.f32 %v1687_v2, %v1697_v52 }
 0xd7b   :  { %v1701_v53 = vmul.f32 %v1699_v49, %v2773_v55 }
 0xd7d   :  { %v1703_v56 = vmul.f32 %v1701_v53, %v1701_v53 }
 0xd7f   :  { %1706 = vadd.xlane.f32.xlu1 %v1703_v56 }
 0xdea   :  { %v1705_v57 = vpop.xlane.xlu0 %1704 }
 0xdeb   :  { %v1708_v63 = vmul.f32 0.015625, %v1705_v57 }
 0xded   :  { %v1710_v0 = vadd.f32 1e-05, %v1708_v63 }
 0xdef   :  { %2314 = vrsqrt.f32 %v1710_v0  ;;  %vm1718_vm8 = vweird.f32 %v1710_v0 }
 0xdf2   :  { %v1707_v3 = vpop.xlane.xlu1 %1706 }
 0xdf3   :  { %v1709_v4 = vmul.f32 0.015625, %v1707_v3 }
 0xdf5   :  { %v2315_v27 = vpop.eup %2314  ;;  %v1711_v43 = vadd.f32 1e-05, %v1709_v4 }
 0xdf6   :  { %v1713_v23 = vmul.f32 %v2315_v27, %v1710_v0  ;;  %vm1719_vm7 = vweird.f32 %v2315_v27 }
 0xdf7   :  { %2316 = vrsqrt.f32 %v1711_v43  ;;  %vm1720_vm9 = vmor %vm1718_vm8, %vm1719_vm7  ;;  %vm1728_vm11 = vweird.f32 %v1711_v43 }
 0xdf8   :  { %v1714_v32 = vmul.f32 %v2315_v27, %v1713_v23 }
 0xdfa   :  { %v1715_v6 = vmul.f32 0.5, %v1714_v32 }
 0xdfc   :  { %v1716_v9 = vsub.f32 1.5, %v1715_v6 }
 0xdfd   :  { %v2317_v11 = vpop.eup %2316 }
 0xdfe   :  { %v1717_v54 = vmul.f32 %v2315_v27, %v1716_v9  ;;  %v1723_v55 = vmul.f32 %v2317_v11, %v1711_v43  ;;  %vm1729_vm10 = vweird.f32 %v2317_v11 }
 0xdff   :  { %vm1730_vm12 = vmor %vm1728_vm11, %vm1729_vm10 }
 0xe00   :  { %v1721_v7 = vsel %vm1720_vm9, %v2315_v27, %v1717_v54  ;;  %v1724_v15 = vmul.f32 %v2317_v11, %v1723_v55 }
 0xe01   :  { %v1732_v25 = vmul.f32 %v1721_v7, %v1698_v35 }
 0xe02   :  { %v1725_v26 = vmul.f32 0.5, %v1724_v15 }
 0xe03   :  { %v1737_v31 = vmul.f32 %v2268_v59, %v1732_v25 }
 0xe04   :  { %v1726_v34 = vsub.f32 1.5, %v1725_v26 }
 0xe05   :  { %v1742_v28 = vadd.f32 %v2269_v16, %v1737_v31 }
 0xe06   :  { %v1727_v44 = vmul.f32 %v2317_v11, %v1726_v34 }
 0xe07   :  { %1744 = vst [vmem:[%s2985_s13] sm:$0xff] %v1742_v28 }
 0xe08   :  { %v1731_v58 = vsel %vm1730_vm12, %v2317_v11, %v1727_v44 }
 0xe09   :  { %v1733_v62 = vmul.f32 %v1731_v58, %v1699_v49 }
 0xe0b   :  { %v1738_v1 = vmul.f32 %v2268_v59, %v1733_v62 }
 0xe0d   :  { %v1743_v10 = vadd.f32 %v2269_v16, %v1738_v1 }
 0xe0f   :  { %1745 = vst [vmem:[%s2985_s13 + $0x8] sm:$0xff] %v1743_v10 }
 0xe10   :  { %1750 = vsyncpa [#allocation3], 1 }
 0xe11   :  { %1751 = vsyncpa [#allocation5], 1 }
 0xe12   :  { %1752 = vsyncpa [#allocation8], 1 }
 0xe13   :  { %1753 = vsyncpa [#allocation11], 1 }

</bundles_post_ra>
